<compile_context>
chip_gen: v7x
topology: tpu7x:2x2x1
jax: 0.10.0
libtpu: 0.0.40
codegen_flags: <defaults>
</compile_context>

<pallas_src>
from functools import partial

import jax
import jax.numpy as jnp
from jax import lax
from jax.experimental import pallas as pl
from jax.experimental.pallas import tpu as pltpu

EPS = 1e-5  # PyTorch BatchNorm2d default


def _round_up(x, m):
    return (x + m - 1) // m * m


# --------------------- pass 1: pad+concat+conv1 + BN1 stats ------------------
def conv1_kernel(H, W, Wp, x2_ref, x1_ref, w1_ref, mrow_ref,
                 y1_ref, s1_ref, q1_ref, xpad):
    # x2_ref : (1, C2, H*Wp) bf16   skip connection, width pre-padded to Wp
    # x1_ref : (1, C1, H*Wp) bf16   upsampled feature, width pre-padded to Wp
    # w1_ref : (9, Cmid_p, Cin) bf16 tap-major conv1 weights
    # mrow   : (1, H*Wp) f32        1.0 on valid columns, 0.0 on wrap columns
    # y1_ref : (1, Cmid_p, H*Wp) bf16 conv1 output (channel-major, wide grid)
    # s1/q1  : (1, Cmid_p, 1) f32   per-tile sum / sum-of-squares for BN1
    # xpad   : VMEM (Cin, (H+3)*Wp) bf16 flat padded input (channel-major)
    C2 = x2_ref.shape[1]
    Cin = xpad.shape[0]
    HWp = H * Wp
    lo = Wp + 1            # flat index of interior pixel (0, 0)
    hi = lo + HWp          # == (H + 1) * Wp + 1

    # Zero the halo the interior fill never touches (top border, bottom
    # border, spare row that keeps the shifted tap reads in-bounds).
    xpad[:, 0:lo] = jnp.zeros((Cin, lo), xpad.dtype)
    xpad[:, hi:] = jnp.zeros((Cin, xpad.shape[1] - hi), xpad.dtype)

    # Fused F.pad + torch.cat([x2, x1], dim=1): both sources land in adjacent
    # channel (sublane) ranges as one contiguous lane-dense slab; the two
    # zero columns per row of the inputs become the left/right conv padding.
    xpad[0:C2, lo:hi] = x2_ref[0]
    xpad[C2:Cin, lo:hi] = x1_ref[0]

    # 3x3 conv = 9 accumulated per-tap MXU matmuls; each tap is a contiguous
    # lane slice of the flat padded scratch (no transposes, no im2col patch).
    acc = None
    for ky in range(3):
        for kx in range(3):
            t = ky * 3 + kx
            off = ky * Wp + kx
            p = jnp.dot(w1_ref[t], xpad[:, off:off + HWp],
                        preferred_element_type=jnp.float32)
            acc = p if acc is None else acc + p

    # BN1 partial stats from the f32 accumulator (before bf16 downcast),
    # masking out the wrap-around columns of the wide grid.
    mrow = mrow_ref[...]
    am = acc * mrow
    s1_ref[0] = jnp.sum(am, axis=1, keepdims=True)
    q1_ref[0] = jnp.sum(am * acc, axis=1, keepdims=True)
    y1_ref[0] = acc.astype(y1_ref.dtype)   # bf16 HBM round trip


# ----------------- pass 2: BN1-apply + ReLU + conv2 + BN2 stats --------------
def conv2_kernel(H, W, Wp, y1_ref, sc_ref, sh_ref, w2_ref, mrow_ref,
                 y2_ref, s2_ref, q2_ref, mid):
    # y1_ref : (1, Cmid_p, H*Wp) bf16 ; sc/sh: (Cmid_p, 1) folded BN1 params
    # w2_ref : (9, Cout, Cmid_p) bf16 ; y2: (1, Cout, H*Wp) f32 ; s2/q2 stats
    # mid    : VMEM (Cmid_p, (H+3)*Wp) bf16 padded BN1+ReLU activation
    Cmid = mid.shape[0]
    HWp = H * Wp
    lo = Wp + 1
    hi = lo + HWp

    mid[:, 0:lo] = jnp.zeros((Cmid, lo), mid.dtype)
    mid[:, hi:] = jnp.zeros((Cmid, mid.shape[1] - hi), mid.dtype)

    mrow = mrow_ref[...]
    # BN1 (pre-folded scale/shift) + ReLU in f32; zeroing the wrap columns
    # makes the single contiguous store below also write the conv padding.
    a = jnp.maximum(y1_ref[0].astype(jnp.float32) * sc_ref[...] + sh_ref[...],
                    0.0) * mrow
    mid[:, lo:hi] = a.astype(mid.dtype)

    acc = None
    for ky in range(3):
        for kx in range(3):
            t = ky * 3 + kx
            off = ky * Wp + kx
            p = jnp.dot(w2_ref[t], mid[:, off:off + HWp],
                        preferred_element_type=jnp.float32)
            acc = p if acc is None else acc + p

    am = acc * mrow
    s2_ref[0] = jnp.sum(am, axis=1, keepdims=True)
    q2_ref[0] = jnp.sum(am * acc, axis=1, keepdims=True)
    y2_ref[0] = acc


# --------------------------- pass 3: BN2-apply + ReLU ------------------------
def bn2_relu_kernel(y2_ref, sc_ref, sh_ref, o_ref):
    o_ref[0] = jnp.maximum(y2_ref[0] * sc_ref[...] + sh_ref[...], 0.0)


# ----------------------- JAX glue: BN fold & upsample ------------------------
def _fold_bn(ssum, ssq, gamma, beta, count):
    """Training-mode BatchNorm folded to per-channel scale/shift (f32)."""
    s = jnp.sum(ssum, axis=0)[:, 0]
    q = jnp.sum(ssq, axis=0)[:, 0]
    mean = s / count
    var = jnp.maximum(q / count - mean * mean, 0.0)   # biased var; clamp cancellation
    scale = gamma * lax.rsqrt(var + EPS)
    shift = beta - mean * scale
    return scale[:, None], shift[:, None]             # (C, 1)


def _interp_matrix(n_in, n_out):
    """Interpolation matrix for bilinear upsampling, align_corners=True."""
    i = jnp.arange(n_out, dtype=jnp.float32)
    if n_out == 1:
        s = jnp.zeros((n_out,), jnp.float32)
    else:
        s = i * (n_in - 1) / (n_out - 1)
    j0 = jnp.clip(jnp.floor(s).astype(jnp.int32), 0, n_in - 1)
    j1 = jnp.clip(j0 + 1, 0, n_in - 1)
    w_hi = s - j0.astype(jnp.float32)
    M = jnp.zeros((n_out, n_in), jnp.float32)
    M = M.at[jnp.arange(n_out), j0].add(1.0 - w_hi)
    M = M.at[jnp.arange(n_out), j1].add(w_hi)
    return M


def _upsample_align(x1, x2):
    """nn.Upsample(scale_factor=2, bilinear, align_corners=True) + F.pad to x2."""
    N, C1, H1, W1 = x1.shape
    Mh = _interp_matrix(H1, 2 * H1)
    Mw = _interp_matrix(W1, 2 * W1)
    up = jnp.einsum('hi,nciw->nchw', Mh, x1)
    up = jnp.einsum('wj,nchj->nchw', Mw, up)
    dY = x2.shape[2] - up.shape[2]
    dX = x2.shape[3] - up.shape[3]
    return jnp.pad(up, ((0, 0), (0, 0),
                        (dY // 2, dY - dY // 2), (dX // 2, dX - dX // 2)))


# --------------------------------- Up.forward --------------------------------
def up_forward(x1, x2, w1, g1, b1, w2, g2, b2):
    """x1/x2: NCHW f32; w1/w2: HWIO (3,3,Cin,Cout); g*/b*: (C,).  Returns NCHW."""
    N, C2, H, W = x2.shape
    C1 = x1.shape[1]
    Cin = C1 + C2
    Cmid = w1.shape[3]
    Cout = w2.shape[3]
    Wp = W + 2
    HWp = H * Wp
    # TODO(synk): for channel counts that break these (not the case for UNet
    # Up blocks), pad the input channels the same way Cmid is padded below.
    assert Cin % 8 == 0 and C2 % 2 == 0, (Cin, C2)
    # Pad conv1 output channels to a sublane multiple; the dummy channels are
    # exactly zero end-to-end (zero weights + zero gamma/beta).
    Cmid_p = max(8, _round_up(Cmid, 8))

    # ---- upsample / alignment pad (index glue, stays in JAX) ----
    x1u = _upsample_align(x1, x2)                          # (N, C1, H, W) f32

    # Channel-major, flat "wide" spatial layout: row stride Wp; the 2 zero
    # columns per row double as the conv's left/right zero padding inside the
    # kernel scratch.  bf16 halves HBM + VMEM traffic (MXU takes bf16 anyway).
    pad_w = ((0, 0), (0, 0), (0, 0), (0, 2))
    x2w = jnp.pad(x2, pad_w).reshape(N, C2, HWp).astype(jnp.bfloat16)
    x1w = jnp.pad(x1u, pad_w).reshape(N, C1, HWp).astype(jnp.bfloat16)

    # Valid-column mask on the wide grid (0.0 on the 2 wrap columns per row).
    mrow = (jnp.arange(HWp) % Wp < W).astype(jnp.float32).reshape(1, HWp)

    # ---- weights: tap-major (9, Cout, Cin), one MXU operand per tap ----
    w1t = jnp.transpose(w1, (0, 1, 3, 2)).reshape(9, Cmid, Cin)
    w1t = jnp.pad(w1t, ((0, 0), (0, Cmid_p - Cmid), (0, 0))).astype(jnp.bfloat16)
    w2p = jnp.pad(w2, ((0, 0), (0, 0), (0, Cmid_p - Cmid), (0, 0)))
    w2t = jnp.transpose(w2p, (0, 1, 3, 2)).reshape(9, Cout, Cmid_p)
    w2t = w2t.astype(jnp.bfloat16)
    g1p = jnp.pad(g1, (0, Cmid_p - Cmid))
    b1p = jnp.pad(b1, (0, Cmid_p - Cmid))

    # TODO(synk): tune per generation (v5e/v6e can go higher; v7x physical
    # VMEM is 64 MiB) and add a halo'd H-tile grid axis at production sizes.
    cparams = pltpu.CompilerParams(dimension_semantics=("parallel",),
                                   vmem_limit_bytes=64 * 1024 * 1024)

    # ---- pass 1: conv1 + BN1 partial statistics ----
    y1, s1, q1 = pl.pallas_call(
        partial(conv1_kernel, H, W, Wp),
        out_shape=(jax.ShapeDtypeStruct((N, Cmid_p, HWp), jnp.bfloat16),
                   jax.ShapeDtypeStruct((N, Cmid_p, 1), jnp.float32),
                   jax.ShapeDtypeStruct((N, Cmid_p, 1), jnp.float32)),
        grid_spec=pltpu.PrefetchScalarGridSpec(
            num_scalar_prefetch=0, grid=(N,),
            in_specs=[pl.BlockSpec((1, C2, HWp), lambda n: (n, 0, 0)),
                      pl.BlockSpec((1, C1, HWp), lambda n: (n, 0, 0)),
                      pl.BlockSpec((9, Cmid_p, Cin), lambda n: (0, 0, 0)),
                      pl.BlockSpec((1, HWp), lambda n: (0, 0))],
            out_specs=(pl.BlockSpec((1, Cmid_p, HWp), lambda n: (n, 0, 0)),
                       pl.BlockSpec((1, Cmid_p, 1), lambda n: (n, 0, 0)),
                       pl.BlockSpec((1, Cmid_p, 1), lambda n: (n, 0, 0))),
            scratch_shapes=[pltpu.VMEM((Cin, (H + 3) * Wp), jnp.bfloat16)]),
        compiler_params=cparams,
    )(x2w, x1w, w1t, mrow)

    sc1, sh1 = _fold_bn(s1, q1, g1p, b1p, float(N * H * W))

    # ---- pass 2: BN1 + ReLU + conv2 + BN2 partial statistics ----
    y2, s2, q2 = pl.pallas_call(
        partial(conv2_kernel, H, W, Wp),
        out_shape=(jax.ShapeDtypeStruct((N, Cout, HWp), jnp.float32),
                   jax.ShapeDtypeStruct((N, Cout, 1), jnp.float32),
                   jax.ShapeDtypeStruct((N, Cout, 1), jnp.float32)),
        grid_spec=pltpu.PrefetchScalarGridSpec(
            num_scalar_prefetch=0, grid=(N,),
            in_specs=[pl.BlockSpec((1, Cmid_p, HWp), lambda n: (n, 0, 0)),
                      pl.BlockSpec((Cmid_p, 1), lambda n: (0, 0)),
                      pl.BlockSpec((Cmid_p, 1), lambda n: (0, 0)),
                      pl.BlockSpec((9, Cout, Cmid_p), lambda n: (0, 0, 0)),
                      pl.BlockSpec((1, HWp), lambda n: (0, 0))],
            out_specs=(pl.BlockSpec((1, Cout, HWp), lambda n: (n, 0, 0)),
                       pl.BlockSpec((1, Cout, 1), lambda n: (n, 0, 0)),
                       pl.BlockSpec((1, Cout, 1), lambda n: (n, 0, 0))),
            scratch_shapes=[pltpu.VMEM((Cmid_p, (H + 3) * Wp), jnp.bfloat16)]),
        compiler_params=cparams,
    )(y1, sc1, sh1, w2t, mrow)

    sc2, sh2 = _fold_bn(s2, q2, g2, b2, float(N * H * W))

    # ---- pass 3: BN2 + ReLU, in place on y2 (aliased) ----
    out_w = pl.pallas_call(
        bn2_relu_kernel,
        out_shape=jax.ShapeDtypeStruct((N, Cout, HWp), jnp.float32),
        grid_spec=pltpu.PrefetchScalarGridSpec(
            num_scalar_prefetch=0, grid=(N,),
            in_specs=[pl.BlockSpec((1, Cout, HWp), lambda n: (n, 0, 0)),
                      pl.BlockSpec((Cout, 1), lambda n: (0, 0)),
                      pl.BlockSpec((Cout, 1), lambda n: (0, 0))],
            out_specs=pl.BlockSpec((1, Cout, HWp), lambda n: (n, 0, 0))),
        input_output_aliases={0: 0},
        compiler_params=cparams,
    )(y2, sc2, sh2)

    # Drop the 2 wrap-around columns per row -> NCHW (matches PyTorch).
    return out_w.reshape(N, Cout, H, Wp)[:, :, :, :W]


# ----------------------------- pure-JAX reference ----------------------------
def _batch_stats(x):
    mean = jnp.mean(x, axis=(0, 2, 3), keepdims=True)
    var = jnp.mean((x - mean) ** 2, axis=(0, 2, 3), keepdims=True)
    return mean, var


def up_forward_ref(x1, x2, w1, g1, b1, w2, g2, b2):
    """Reference mirroring the kernel's precision choices (bf16 conv operands,
    bf16 y1 round trip, f32 accumulation and BN statistics)."""
    x = jnp.concatenate([x2, _upsample_align(x1, x2)], axis=1)
    dn = ('NCHW', 'HWIO', 'NCHW')
    y = lax.conv_general_dilated(x.astype(jnp.bfloat16), w1.astype(jnp.bfloat16),
                                 (1, 1), 'SAME', dimension_numbers=dn,
                                 preferred_element_type=jnp.float32)
    m1, v1 = _batch_stats(y)                            # stats from f32 (as kernel)
    yb = y.astype(jnp.bfloat16).astype(jnp.float32)     # kernel stores y1 in bf16
    a = jnp.maximum((yb - m1) * lax.rsqrt(v1 + EPS) * g1.reshape(1, -1, 1, 1)
                    + b1.reshape(1, -1, 1, 1), 0.0)
    z = lax.conv_general_dilated(a.astype(jnp.bfloat16), w2.astype(jnp.bfloat16),
                                 (1, 1), 'SAME', dimension_numbers=dn,
                                 preferred_element_type=jnp.float32)
    m2, v2 = _batch_stats(z)
    return jnp.maximum((z - m2) * lax.rsqrt(v2 + EPS) * g2.reshape(1, -1, 1, 1)
                       + b2.reshape(1, -1, 1, 1), 0.0)


# ------------------------------------ main -----------------------------------
if __name__ == "__main__":
    key = jax.random.PRNGKey(0)
    k1, k2, kw1, kw2 = jax.random.split(key, 4)

    # Up(in_channels=8, out_channels=8, bilinear=True) -> mid_channels = 4
    N = 2
    C1 = 4            # channels of x1 (low-res feature, gets upsampled)
    C2 = 4            # channels of x2 (skip connection)
    in_channels = C1 + C2
    out_channels = 8
    mid_channels = in_channels // 2
    H1 = W1 = 8       # x1 spatial
    H2 = W2 = 16      # x2 spatial

    x1 = jax.random.normal(k1, (N, C1, H1, W1), jnp.float32)   # NCHW
    x2 = jax.random.normal(k2, (N, C2, H2, W2), jnp.float32)   # NCHW

    # Conv weights in HWIO, bias-free (as in DoubleConv); BN: default init.
    w1 = jax.random.normal(kw1, (3, 3, in_channels, mid_channels), jnp.float32) * 0.1
    w2 = jax.random.normal(kw2, (3, 3, mid_channels, out_channels), jnp.float32) * 0.1
    g1 = jnp.ones((mid_channels,), jnp.float32)
    b1 = jnp.zeros((mid_channels,), jnp.float32)
    g2 = jnp.ones((out_channels,), jnp.float32)
    b2 = jnp.zeros((out_channels,), jnp.float32)

    out = jax.jit(up_forward)(x1, x2, w1, g1, b1, w2, g2, b2)
    out = jax.block_until_ready(out)

    ref = up_forward_ref(x1, x2, w1, g1, b1, w2, g2, b2)
    assert out.shape == (N, out_channels, H2, W2), out.shape
    err = float(jnp.max(jnp.abs(out - ref)))
    assert err < 5e-3, f"max abs err {err}"

    print("KERNEL_OK")
</pallas_src>

<mosaic_0001>
module attributes {stable_mosaic.version = 11 : i64} {
  func.func private @main(%arg0: i32) attributes {dimension_semantics = [#tpu.dimension_semantics<core_parallel>], iteration_bounds = array<i64: 2>, tpu.core_type = #tpu.core_type<sc_scalar_subcore>, window_params = []} {
    return
  }
}

module attributes {stable_mosaic.version = 11 : i64} {
  func.func private @main(%arg0: i32) attributes {dimension_semantics = [#tpu.dimension_semantics<core_parallel>], iteration_bounds = array<i64: 2>, tpu.core_type = #tpu.core_type<sc_scalar_subcore>, window_params = []} {
    return
  }
}

module attributes {stable_mosaic.version = 11 : i64} {
  func.func @conv1_kernel(%arg0: i32, %arg1: memref<1x4x288xbf16, #tpu.memory_space<vmem>>, %arg2: memref<1x4x288xbf16, #tpu.memory_space<vmem>>, %arg3: memref<9x8x8xbf16, #tpu.memory_space<vmem>>, %arg4: memref<1x288xf32, #tpu.memory_space<vmem>>, %arg5: memref<1x8x288xbf16, #tpu.memory_space<vmem>>, %arg6: memref<1x8x1xf32, #tpu.memory_space<vmem>>, %arg7: memref<1x8x1xf32, #tpu.memory_space<vmem>>, %arg8: memref<8x342xbf16, #tpu.memory_space<vmem>>) attributes {dimension_semantics = [#tpu.dimension_semantics<parallel>], iteration_bounds = array<i64: 2>, scalar_prefetch = 0 : i64, scratch_operands = 1 : i64, tpu.core_type = #tpu.core_type<tc>, window_params = [{transform_indices = @transform_0, window_bounds = array<i64: 1, 4, 288>}, {transform_indices = @transform_1, window_bounds = array<i64: 1, 4, 288>}, {pipeline_mode = #tpu.pipeline_mode<synchronous>, transform_indices = @transform_2, window_bounds = array<i64: 9, 8, 8>}, {pipeline_mode = #tpu.pipeline_mode<synchronous>, transform_indices = @transform_3, window_bounds = array<i64: 1, 288>}, {transform_indices = @transform_4, window_bounds = array<i64: 1, 8, 288>}, {transform_indices = @transform_5, window_bounds = array<i64: 1, 8, 1>}, {transform_indices = @transform_6, window_bounds = array<i64: 1, 8, 1>}]} {
    %cst = arith.constant 0.000000e+00 : bf16
    %0 = vector.broadcast %cst : bf16 to vector<8x19xbf16>
    %c0 = arith.constant 0 : index
    %c0_0 = arith.constant 0 : index
    %1 = vector.load %arg8[%c0, %c0_0] : memref<8x342xbf16, #tpu.memory_space<vmem>>, vector<8x19xbf16>
    tpu.vector_store %arg8[%c0, %c0_0], %0 {strides = array<i32>} : memref<8x342xbf16, #tpu.memory_space<vmem>>, vector<8x19xbf16>,
    %cst_1 = arith.constant 0.000000e+00 : bf16
    %2 = vector.broadcast %cst_1 : bf16 to vector<8x35xbf16>
    %c0_2 = arith.constant 0 : index
    %c307 = arith.constant 307 : index
    %3 = vector.load %arg8[%c0_2, %c307] : memref<8x342xbf16, #tpu.memory_space<vmem>>, vector<8x35xbf16>
    tpu.vector_store %arg8[%c0_2, %c307], %2 {strides = array<i32>} : memref<8x342xbf16, #tpu.memory_space<vmem>>, vector<8x35xbf16>,
    %c0_3 = arith.constant 0 : index
    %c0_4 = arith.constant 0 : index
    %c0_5 = arith.constant 0 : index
    %4 = vector.load %arg1[%c0_3, %c0_4, %c0_5] : memref<1x4x288xbf16, #tpu.memory_space<vmem>>, vector<1x4x288xbf16>
    %5 = vector.shape_cast %4 : vector<1x4x288xbf16> to vector<4x288xbf16>
    %c0_6 = arith.constant 0 : index
    %c19 = arith.constant 19 : index
    %6 = vector.load %arg8[%c0_6, %c19] : memref<8x342xbf16, #tpu.memory_space<vmem>>, vector<4x288xbf16>
    tpu.vector_store %arg8[%c0_6, %c19], %5 {strides = array<i32>} : memref<8x342xbf16, #tpu.memory_space<vmem>>, vector<4x288xbf16>,
    %c0_7 = arith.constant 0 : index
    %c0_8 = arith.constant 0 : index
    %c0_9 = arith.constant 0 : index
    %7 = vector.load %arg2[%c0_7, %c0_8, %c0_9] : memref<1x4x288xbf16, #tpu.memory_space<vmem>>, vector<1x4x288xbf16>
    %8 = vector.shape_cast %7 : vector<1x4x288xbf16> to vector<4x288xbf16>
    %c4 = arith.constant 4 : index
    %c19_10 = arith.constant 19 : index
    %9 = vector.load %arg8[%c4, %c19_10] : memref<8x342xbf16, #tpu.memory_space<vmem>>, vector<4x288xbf16>
    tpu.vector_store %arg8[%c4, %c19_10], %8 {strides = array<i32>} : memref<8x342xbf16, #tpu.memory_space<vmem>>, vector<4x288xbf16>,
    %c0_11 = arith.constant 0 : index
    %c0_12 = arith.constant 0 : index
    %c0_13 = arith.constant 0 : index
    %10 = vector.load %arg3[%c0_11, %c0_12, %c0_13] : memref<9x8x8xbf16, #tpu.memory_space<vmem>>, vector<1x8x8xbf16>
    %11 = vector.shape_cast %10 : vector<1x8x8xbf16> to vector<8x8xbf16>
    %c0_14 = arith.constant 0 : index
    %c0_15 = arith.constant 0 : index
    %12 = vector.load %arg8[%c0_14, %c0_15] : memref<8x342xbf16, #tpu.memory_space<vmem>>, vector<8x288xbf16>
    %cst_16 = arith.constant dense<0.000000e+00> : vector<8x288xf32>
    %13 = tpu.matmul %11, %12, %cst_16 {dimension_numbers = #tpu.dot_dimension_numbers<[1], [0], [0], [1], [0, 0, 1, 1], [], []>} : vector<8x8xbf16>, vector<8x288xbf16>, vector<8x288xf32> -> vector<8x288xf32>
    %c1 = arith.constant 1 : index
    %c0_17 = arith.constant 0 : index
    %c0_18 = arith.constant 0 : index
    %14 = vector.load %arg3[%c1, %c0_17, %c0_18] : memref<9x8x8xbf16, #tpu.memory_space<vmem>>, vector<1x8x8xbf16>
    %15 = vector.shape_cast %14 : vector<1x8x8xbf16> to vector<8x8xbf16>
    %c0_19 = arith.constant 0 : index
    %c1_20 = arith.constant 1 : index
    %16 = vector.load %arg8[%c0_19, %c1_20] : memref<8x342xbf16, #tpu.memory_space<vmem>>, vector<8x288xbf16>
    %cst_21 = arith.constant dense<0.000000e+00> : vector<8x288xf32>
    %17 = tpu.matmul %15, %16, %cst_21 {dimension_numbers = #tpu.dot_dimension_numbers<[1], [0], [0], [1], [0, 0, 1, 1], [], []>} : vector<8x8xbf16>, vector<8x288xbf16>, vector<8x288xf32> -> vector<8x288xf32>
    %18 = arith.addf %13, %17 : vector<8x288xf32>
    %c2 = arith.constant 2 : index
    %c0_22 = arith.constant 0 : index
    %c0_23 = arith.constant 0 : index
    %19 = vector.load %arg3[%c2, %c0_22, %c0_23] : memref<9x8x8xbf16, #tpu.memory_space<vmem>>, vector<1x8x8xbf16>
    %20 = vector.shape_cast %19 : vector<1x8x8xbf16> to vector<8x8xbf16>
    %c0_24 = arith.constant 0 : index
    %c2_25 = arith.constant 2 : index
    %21 = vector.load %arg8[%c0_24, %c2_25] : memref<8x342xbf16, #tpu.memory_space<vmem>>, vector<8x288xbf16>
    %cst_26 = arith.constant dense<0.000000e+00> : vector<8x288xf32>
    %22 = tpu.matmul %20, %21, %cst_26 {dimension_numbers = #tpu.dot_dimension_numbers<[1], [0], [0], [1], [0, 0, 1, 1], [], []>} : vector<8x8xbf16>, vector<8x288xbf16>, vector<8x288xf32> -> vector<8x288xf32>
    %23 = arith.addf %18, %22 : vector<8x288xf32>
    %c3 = arith.constant 3 : index
    %c0_27 = arith.constant 0 : index
    %c0_28 = arith.constant 0 : index
    %24 = vector.load %arg3[%c3, %c0_27, %c0_28] : memref<9x8x8xbf16, #tpu.memory_space<vmem>>, vector<1x8x8xbf16>
    %25 = vector.shape_cast %24 : vector<1x8x8xbf16> to vector<8x8xbf16>
    %c0_29 = arith.constant 0 : index
    %c18 = arith.constant 18 : index
    %26 = vector.load %arg8[%c0_29, %c18] : memref<8x342xbf16, #tpu.memory_space<vmem>>, vector<8x288xbf16>
    %cst_30 = arith.constant dense<0.000000e+00> : vector<8x288xf32>
    %27 = tpu.matmul %25, %26, %cst_30 {dimension_numbers = #tpu.dot_dimension_numbers<[1], [0], [0], [1], [0, 0, 1, 1], [], []>} : vector<8x8xbf16>, vector<8x288xbf16>, vector<8x288xf32> -> vector<8x288xf32>
    %28 = arith.addf %23, %27 : vector<8x288xf32>
    %c4_31 = arith.constant 4 : index
    %c0_32 = arith.constant 0 : index
    %c0_33 = arith.constant 0 : index
    %29 = vector.load %arg3[%c4_31, %c0_32, %c0_33] : memref<9x8x8xbf16, #tpu.memory_space<vmem>>, vector<1x8x8xbf16>
    %30 = vector.shape_cast %29 : vector<1x8x8xbf16> to vector<8x8xbf16>
    %c0_34 = arith.constant 0 : index
    %c19_35 = arith.constant 19 : index
    %31 = vector.load %arg8[%c0_34, %c19_35] : memref<8x342xbf16, #tpu.memory_space<vmem>>, vector<8x288xbf16>
    %cst_36 = arith.constant dense<0.000000e+00> : vector<8x288xf32>
    %32 = tpu.matmul %30, %31, %cst_36 {dimension_numbers = #tpu.dot_dimension_numbers<[1], [0], [0], [1], [0, 0, 1, 1], [], []>} : vector<8x8xbf16>, vector<8x288xbf16>, vector<8x288xf32> -> vector<8x288xf32>
    %33 = arith.addf %28, %32 : vector<8x288xf32>
    %c5 = arith.constant 5 : index
    %c0_37 = arith.constant 0 : index
    %c0_38 = arith.constant 0 : index
    %34 = vector.load %arg3[%c5, %c0_37, %c0_38] : memref<9x8x8xbf16, #tpu.memory_space<vmem>>, vector<1x8x8xbf16>
    %35 = vector.shape_cast %34 : vector<1x8x8xbf16> to vector<8x8xbf16>
    %c0_39 = arith.constant 0 : index
    %c20 = arith.constant 20 : index
    %36 = vector.load %arg8[%c0_39, %c20] : memref<8x342xbf16, #tpu.memory_space<vmem>>, vector<8x288xbf16>
    %cst_40 = arith.constant dense<0.000000e+00> : vector<8x288xf32>
    %37 = tpu.matmul %35, %36, %cst_40 {dimension_numbers = #tpu.dot_dimension_numbers<[1], [0], [0], [1], [0, 0, 1, 1], [], []>} : vector<8x8xbf16>, vector<8x288xbf16>, vector<8x288xf32> -> vector<8x288xf32>
    %38 = arith.addf %33, %37 : vector<8x288xf32>
    %c6 = arith.constant 6 : index
    %c0_41 = arith.constant 0 : index
    %c0_42 = arith.constant 0 : index
    %39 = vector.load %arg3[%c6, %c0_41, %c0_42] : memref<9x8x8xbf16, #tpu.memory_space<vmem>>, vector<1x8x8xbf16>
    %40 = vector.shape_cast %39 : vector<1x8x8xbf16> to vector<8x8xbf16>
    %c0_43 = arith.constant 0 : index
    %c36 = arith.constant 36 : index
    %41 = vector.load %arg8[%c0_43, %c36] : memref<8x342xbf16, #tpu.memory_space<vmem>>, vector<8x288xbf16>
    %cst_44 = arith.constant dense<0.000000e+00> : vector<8x288xf32>
    %42 = tpu.matmul %40, %41, %cst_44 {dimension_numbers = #tpu.dot_dimension_numbers<[1], [0], [0], [1], [0, 0, 1, 1], [], []>} : vector<8x8xbf16>, vector<8x288xbf16>, vector<8x288xf32> -> vector<8x288xf32>
    %43 = arith.addf %38, %42 : vector<8x288xf32>
    %c7 = arith.constant 7 : index
    %c0_45 = arith.constant 0 : index
    %c0_46 = arith.constant 0 : index
    %44 = vector.load %arg3[%c7, %c0_45, %c0_46] : memref<9x8x8xbf16, #tpu.memory_space<vmem>>, vector<1x8x8xbf16>
    %45 = vector.shape_cast %44 : vector<1x8x8xbf16> to vector<8x8xbf16>
    %c0_47 = arith.constant 0 : index
    %c37 = arith.constant 37 : index
    %46 = vector.load %arg8[%c0_47, %c37] : memref<8x342xbf16, #tpu.memory_space<vmem>>, vector<8x288xbf16>
    %cst_48 = arith.constant dense<0.000000e+00> : vector<8x288xf32>
    %47 = tpu.matmul %45, %46, %cst_48 {dimension_numbers = #tpu.dot_dimension_numbers<[1], [0], [0], [1], [0, 0, 1, 1], [], []>} : vector<8x8xbf16>, vector<8x288xbf16>, vector<8x288xf32> -> vector<8x288xf32>
    %48 = arith.addf %43, %47 : vector<8x288xf32>
    %c8 = arith.constant 8 : index
    %c0_49 = arith.constant 0 : index
    %c0_50 = arith.constant 0 : index
    %49 = vector.load %arg3[%c8, %c0_49, %c0_50] : memref<9x8x8xbf16, #tpu.memory_space<vmem>>, vector<1x8x8xbf16>
    %50 = vector.shape_cast %49 : vector<1x8x8xbf16> to vector<8x8xbf16>
    %c0_51 = arith.constant 0 : index
    %c38 = arith.constant 38 : index
    %51 = vector.load %arg8[%c0_51, %c38] : memref<8x342xbf16, #tpu.memory_space<vmem>>, vector<8x288xbf16>
    %cst_52 = arith.constant dense<0.000000e+00> : vector<8x288xf32>
    %52 = tpu.matmul %50, %51, %cst_52 {dimension_numbers = #tpu.dot_dimension_numbers<[1], [0], [0], [1], [0, 0, 1, 1], [], []>} : vector<8x8xbf16>, vector<8x288xbf16>, vector<8x288xf32> -> vector<8x288xf32>
    %53 = arith.addf %48, %52 : vector<8x288xf32>
    %c0_53 = arith.constant 0 : index
    %c0_54 = arith.constant 0 : index
    %54 = vector.load %arg4[%c0_53, %c0_54] : memref<1x288xf32, #tpu.memory_space<vmem>>, vector<1x288xf32>
    %55 = vector.broadcast %54 : vector<1x288xf32> to vector<8x288xf32>
    %56 = arith.mulf %53, %55 : vector<8x288xf32>
    %cst_55 = arith.constant dense<0.000000e+00> : vector<8xf32>
    %57 = vector.multi_reduction <add>, %56, %cst_55 [1] : vector<8x288xf32> to vector<8xf32>
    %58 = vector.shape_cast %57 : vector<8xf32> to vector<8x1xf32>
    %c0_56 = arith.constant 0 : index
    %c0_57 = arith.constant 0 : index
    %c0_58 = arith.constant 0 : index
    %59 = vector.load %arg6[%c0_56, %c0_57, %c0_58] : memref<1x8x1xf32, #tpu.memory_space<vmem>>, vector<1x8x1xf32>
    %60 = vector.shape_cast %59 : vector<1x8x1xf32> to vector<8x1xf32>
    %61 = vector.shape_cast %58 : vector<8x1xf32> to vector<1x8x1xf32>
    tpu.vector_store %arg6[%c0_56, %c0_57, %c0_58], %61 {strides = array<i32>} : memref<1x8x1xf32, #tpu.memory_space<vmem>>, vector<1x8x1xf32>,
    %62 = arith.mulf %56, %53 : vector<8x288xf32>
    %cst_59 = arith.constant dense<0.000000e+00> : vector<8xf32>
    %63 = vector.multi_reduction <add>, %62, %cst_59 [1] : vector<8x288xf32> to vector<8xf32>
    %64 = vector.shape_cast %63 : vector<8xf32> to vector<8x1xf32>
    %c0_60 = arith.constant 0 : index
    %c0_61 = arith.constant 0 : index
    %c0_62 = arith.constant 0 : index
    %65 = vector.load %arg7[%c0_60, %c0_61, %c0_62] : memref<1x8x1xf32, #tpu.memory_space<vmem>>, vector<1x8x1xf32>
    %66 = vector.shape_cast %65 : vector<1x8x1xf32> to vector<8x1xf32>
    %67 = vector.shape_cast %64 : vector<8x1xf32> to vector<1x8x1xf32>
    tpu.vector_store %arg7[%c0_60, %c0_61, %c0_62], %67 {strides = array<i32>} : memref<1x8x1xf32, #tpu.memory_space<vmem>>, vector<1x8x1xf32>,
    %68 = arith.truncf %53 : vector<8x288xf32> to vector<8x288xbf16>
    %c0_63 = arith.constant 0 : index
    %c0_64 = arith.constant 0 : index
    %c0_65 = arith.constant 0 : index
    %69 = vector.load %arg5[%c0_63, %c0_64, %c0_65] : memref<1x8x288xbf16, #tpu.memory_space<vmem>>, vector<1x8x288xbf16>
    %70 = vector.shape_cast %69 : vector<1x8x288xbf16> to vector<8x288xbf16>
    %71 = vector.shape_cast %68 : vector<8x288xbf16> to vector<1x8x288xbf16>
    tpu.vector_store %arg5[%c0_63, %c0_64, %c0_65], %71 {strides = array<i32>} : memref<1x8x288xbf16, #tpu.memory_space<vmem>>, vector<1x8x288xbf16>,
    return
  }
  func.func @transform_0(%arg0: i32) -> (i32, i32, i32) {
    %c0_i32 = arith.constant 0 : i32
    %c0_i32_0 = arith.constant 0 : i32
    %c0_i32_1 = arith.constant 0 : i32
    return %arg0, %c0_i32, %c0_i32_0 : i32, i32, i32
  }
  func.func @transform_1(%arg0: i32) -> (i32, i32, i32) {
    %c0_i32 = arith.constant 0 : i32
    %c0_i32_0 = arith.constant 0 : i32
    %c0_i32_1 = arith.constant 0 : i32
    return %arg0, %c0_i32, %c0_i32_0 : i32, i32, i32
  }
  func.func @transform_2(%arg0: i32) -> (i32, i32, i32) {
    %c0_i32 = arith.constant 0 : i32
    %c0_i32_0 = arith.constant 0 : i32
    %c0_i32_1 = arith.constant 0 : i32
    %c0_i32_2 = arith.constant 0 : i32
    return %c0_i32, %c0_i32_0, %c0_i32_1 : i32, i32, i32
  }
  func.func @transform_3(%arg0: i32) -> (i32, i32) {
    %c0_i32 = arith.constant 0 : i32
    %c0_i32_0 = arith.constant 0 : i32
    %c0_i32_1 = arith.constant 0 : i32
    return %c0_i32, %c0_i32_0 : i32, i32
  }
  func.func @transform_4(%arg0: i32) -> (i32, i32, i32) {
    %c0_i32 = arith.constant 0 : i32
    %c0_i32_0 = arith.constant 0 : i32
    %c0_i32_1 = arith.constant 0 : i32
    return %arg0, %c0_i32, %c0_i32_0 : i32, i32, i32
  }
  func.func @transform_5(%arg0: i32) -> (i32, i32, i32) {
    %c0_i32 = arith.constant 0 : i32
    %c0_i32_0 = arith.constant 0 : i32
    %c0_i32_1 = arith.constant 0 : i32
    return %arg0, %c0_i32, %c0_i32_0 : i32, i32, i32
  }
  func.func @transform_6(%arg0: i32) -> (i32, i32, i32) {
    %c0_i32 = arith.constant 0 : i32
    %c0_i32_0 = arith.constant 0 : i32
    %c0_i32_1 = arith.constant 0 : i32
    return %arg0, %c0_i32, %c0_i32_0 : i32, i32, i32
  }
}

module attributes {stable_mosaic.version = 11 : i64} {
  func.func @bn2_relu_kernel(%arg0: i32, %arg1: memref<1x8x288xf32, #tpu.memory_space<vmem>>, %arg2: memref<8x1xf32, #tpu.memory_space<vmem>>, %arg3: memref<8x1xf32, #tpu.memory_space<vmem>>, %arg4: memref<1x8x288xf32, #tpu.memory_space<vmem>>) attributes {dimension_semantics = [#tpu.dimension_semantics<parallel>], iteration_bounds = array<i64: 2>, scalar_prefetch = 0 : i64, scratch_operands = 0 : i64, tpu.core_type = #tpu.core_type<tc>, window_params = [{transform_indices = @transform_0, window_bounds = array<i64: 1, 8, 288>}, {pipeline_mode = #tpu.pipeline_mode<synchronous>, transform_indices = @transform_1, window_bounds = array<i64: 8, 1>}, {pipeline_mode = #tpu.pipeline_mode<synchronous>, transform_indices = @transform_2, window_bounds = array<i64: 8, 1>}, {transform_indices = @transform_3, window_bounds = array<i64: 1, 8, 288>}]} {
    %c0 = arith.constant 0 : index
    %c0_0 = arith.constant 0 : index
    %c0_1 = arith.constant 0 : index
    %0 = vector.load %arg1[%c0, %c0_0, %c0_1] : memref<1x8x288xf32, #tpu.memory_space<vmem>>, vector<1x8x288xf32>
    %1 = vector.shape_cast %0 : vector<1x8x288xf32> to vector<8x288xf32>
    %c0_2 = arith.constant 0 : index
    %c0_3 = arith.constant 0 : index
    %2 = vector.load %arg2[%c0_2, %c0_3] : memref<8x1xf32, #tpu.memory_space<vmem>>, vector<8x1xf32>
    %3 = vector.broadcast %2 : vector<8x1xf32> to vector<8x288xf32>
    %4 = arith.mulf %1, %3 : vector<8x288xf32>
    %c0_4 = arith.constant 0 : index
    %c0_5 = arith.constant 0 : index
    %5 = vector.load %arg3[%c0_4, %c0_5] : memref<8x1xf32, #tpu.memory_space<vmem>>, vector<8x1xf32>
    %6 = vector.broadcast %5 : vector<8x1xf32> to vector<8x288xf32>
    %7 = arith.addf %4, %6 : vector<8x288xf32>
    %cst = arith.constant 0.000000e+00 : f32
    %8 = vector.broadcast %cst : f32 to vector<8x288xf32>
    %9 = arith.maximumf %7, %8 : vector<8x288xf32>
    %c0_6 = arith.constant 0 : index
    %c0_7 = arith.constant 0 : index
    %c0_8 = arith.constant 0 : index
    %10 = vector.load %arg4[%c0_6, %c0_7, %c0_8] : memref<1x8x288xf32, #tpu.memory_space<vmem>>, vector<1x8x288xf32>
    %11 = vector.shape_cast %10 : vector<1x8x288xf32> to vector<8x288xf32>
    %12 = vector.shape_cast %9 : vector<8x288xf32> to vector<1x8x288xf32>
    tpu.vector_store %arg4[%c0_6, %c0_7, %c0_8], %12 {strides = array<i32>} : memref<1x8x288xf32, #tpu.memory_space<vmem>>, vector<1x8x288xf32>,
    return
  }
  func.func @transform_0(%arg0: i32) -> (i32, i32, i32) {
    %c0_i32 = arith.constant 0 : i32
    %c0_i32_0 = arith.constant 0 : i32
    %c0_i32_1 = arith.constant 0 : i32
    return %arg0, %c0_i32, %c0_i32_0 : i32, i32, i32
  }
  func.func @transform_1(%arg0: i32) -> (i32, i32) {
    %c0_i32 = arith.constant 0 : i32
    %c0_i32_0 = arith.constant 0 : i32
    %c0_i32_1 = arith.constant 0 : i32
    return %c0_i32, %c0_i32_0 : i32, i32
  }
  func.func @transform_2(%arg0: i32) -> (i32, i32) {
    %c0_i32 = arith.constant 0 : i32
    %c0_i32_0 = arith.constant 0 : i32
    %c0_i32_1 = arith.constant 0 : i32
    return %c0_i32, %c0_i32_0 : i32, i32
  }
  func.func @transform_3(%arg0: i32) -> (i32, i32, i32) {
    %c0_i32 = arith.constant 0 : i32
    %c0_i32_0 = arith.constant 0 : i32
    %c0_i32_1 = arith.constant 0 : i32
    return %arg0, %c0_i32, %c0_i32_0 : i32, i32, i32
  }
}

module attributes {stable_mosaic.version = 11 : i64} {
  func.func @conv2_kernel(%arg0: i32, %arg1: memref<1x8x288xbf16, #tpu.memory_space<vmem>>, %arg2: memref<8x1xf32, #tpu.memory_space<vmem>>, %arg3: memref<8x1xf32, #tpu.memory_space<vmem>>, %arg4: memref<9x8x8xbf16, #tpu.memory_space<vmem>>, %arg5: memref<1x288xf32, #tpu.memory_space<vmem>>, %arg6: memref<1x8x288xf32, #tpu.memory_space<vmem>>, %arg7: memref<1x8x1xf32, #tpu.memory_space<vmem>>, %arg8: memref<1x8x1xf32, #tpu.memory_space<vmem>>, %arg9: memref<8x342xbf16, #tpu.memory_space<vmem>>) attributes {dimension_semantics = [#tpu.dimension_semantics<parallel>], iteration_bounds = array<i64: 2>, scalar_prefetch = 0 : i64, scratch_operands = 1 : i64, tpu.core_type = #tpu.core_type<tc>, window_params = [{transform_indices = @transform_0, window_bounds = array<i64: 1, 8, 288>}, {pipeline_mode = #tpu.pipeline_mode<synchronous>, transform_indices = @transform_1, window_bounds = array<i64: 8, 1>}, {pipeline_mode = #tpu.pipeline_mode<synchronous>, transform_indices = @transform_2, window_bounds = array<i64: 8, 1>}, {pipeline_mode = #tpu.pipeline_mode<synchronous>, transform_indices = @transform_3, window_bounds = array<i64: 9, 8, 8>}, {pipeline_mode = #tpu.pipeline_mode<synchronous>, transform_indices = @transform_4, window_bounds = array<i64: 1, 288>}, {transform_indices = @transform_5, window_bounds = array<i64: 1, 8, 288>}, {transform_indices = @transform_6, window_bounds = array<i64: 1, 8, 1>}, {transform_indices = @transform_7, window_bounds = array<i64: 1, 8, 1>}]} {
    %cst = arith.constant 0.000000e+00 : bf16
    %0 = vector.broadcast %cst : bf16 to vector<8x19xbf16>
    %c0 = arith.constant 0 : index
    %c0_0 = arith.constant 0 : index
    %1 = vector.load %arg9[%c0, %c0_0] : memref<8x342xbf16, #tpu.memory_space<vmem>>, vector<8x19xbf16>
    tpu.vector_store %arg9[%c0, %c0_0], %0 {strides = array<i32>} : memref<8x342xbf16, #tpu.memory_space<vmem>>, vector<8x19xbf16>,
    %cst_1 = arith.constant 0.000000e+00 : bf16
    %2 = vector.broadcast %cst_1 : bf16 to vector<8x35xbf16>
    %c0_2 = arith.constant 0 : index
    %c307 = arith.constant 307 : index
    %3 = vector.load %arg9[%c0_2, %c307] : memref<8x342xbf16, #tpu.memory_space<vmem>>, vector<8x35xbf16>
    tpu.vector_store %arg9[%c0_2, %c307], %2 {strides = array<i32>} : memref<8x342xbf16, #tpu.memory_space<vmem>>, vector<8x35xbf16>,
    %c0_3 = arith.constant 0 : index
    %c0_4 = arith.constant 0 : index
    %4 = vector.load %arg5[%c0_3, %c0_4] : memref<1x288xf32, #tpu.memory_space<vmem>>, vector<1x288xf32>
    %c0_5 = arith.constant 0 : index
    %c0_6 = arith.constant 0 : index
    %c0_7 = arith.constant 0 : index
    %5 = vector.load %arg1[%c0_5, %c0_6, %c0_7] : memref<1x8x288xbf16, #tpu.memory_space<vmem>>, vector<1x8x288xbf16>
    %6 = vector.shape_cast %5 : vector<1x8x288xbf16> to vector<8x288xbf16>
    %7 = arith.extf %6 : vector<8x288xbf16> to vector<8x288xf32>
    %c0_8 = arith.constant 0 : index
    %c0_9 = arith.constant 0 : index
    %8 = vector.load %arg2[%c0_8, %c0_9] : memref<8x1xf32, #tpu.memory_space<vmem>>, vector<8x1xf32>
    %9 = vector.broadcast %8 : vector<8x1xf32> to vector<8x288xf32>
    %10 = arith.mulf %7, %9 : vector<8x288xf32>
    %c0_10 = arith.constant 0 : index
    %c0_11 = arith.constant 0 : index
    %11 = vector.load %arg3[%c0_10, %c0_11] : memref<8x1xf32, #tpu.memory_space<vmem>>, vector<8x1xf32>
    %12 = vector.broadcast %11 : vector<8x1xf32> to vector<8x288xf32>
    %13 = arith.addf %10, %12 : vector<8x288xf32>
    %cst_12 = arith.constant 0.000000e+00 : f32
    %14 = vector.broadcast %cst_12 : f32 to vector<8x288xf32>
    %15 = arith.maximumf %13, %14 : vector<8x288xf32>
    %16 = vector.broadcast %4 : vector<1x288xf32> to vector<8x288xf32>
    %17 = arith.mulf %15, %16 : vector<8x288xf32>
    %18 = arith.truncf %17 : vector<8x288xf32> to vector<8x288xbf16>
    %c0_13 = arith.constant 0 : index
    %c19 = arith.constant 19 : index
    %19 = vector.load %arg9[%c0_13, %c19] : memref<8x342xbf16, #tpu.memory_space<vmem>>, vector<8x288xbf16>
    tpu.vector_store %arg9[%c0_13, %c19], %18 {strides = array<i32>} : memref<8x342xbf16, #tpu.memory_space<vmem>>, vector<8x288xbf16>,
    %c0_14 = arith.constant 0 : index
    %c0_15 = arith.constant 0 : index
    %c0_16 = arith.constant 0 : index
    %20 = vector.load %arg4[%c0_14, %c0_15, %c0_16] : memref<9x8x8xbf16, #tpu.memory_space<vmem>>, vector<1x8x8xbf16>
    %21 = vector.shape_cast %20 : vector<1x8x8xbf16> to vector<8x8xbf16>
    %c0_17 = arith.constant 0 : index
    %c0_18 = arith.constant 0 : index
    %22 = vector.load %arg9[%c0_17, %c0_18] : memref<8x342xbf16, #tpu.memory_space<vmem>>, vector<8x288xbf16>
    %cst_19 = arith.constant dense<0.000000e+00> : vector<8x288xf32>
    %23 = tpu.matmul %21, %22, %cst_19 {dimension_numbers = #tpu.dot_dimension_numbers<[1], [0], [0], [1], [0, 0, 1, 1], [], []>} : vector<8x8xbf16>, vector<8x288xbf16>, vector<8x288xf32> -> vector<8x288xf32>
    %c1 = arith.constant 1 : index
    %c0_20 = arith.constant 0 : index
    %c0_21 = arith.constant 0 : index
    %24 = vector.load %arg4[%c1, %c0_20, %c0_21] : memref<9x8x8xbf16, #tpu.memory_space<vmem>>, vector<1x8x8xbf16>
    %25 = vector.shape_cast %24 : vector<1x8x8xbf16> to vector<8x8xbf16>
    %c0_22 = arith.constant 0 : index
    %c1_23 = arith.constant 1 : index
    %26 = vector.load %arg9[%c0_22, %c1_23] : memref<8x342xbf16, #tpu.memory_space<vmem>>, vector<8x288xbf16>
    %cst_24 = arith.constant dense<0.000000e+00> : vector<8x288xf32>
    %27 = tpu.matmul %25, %26, %cst_24 {dimension_numbers = #tpu.dot_dimension_numbers<[1], [0], [0], [1], [0, 0, 1, 1], [], []>} : vector<8x8xbf16>, vector<8x288xbf16>, vector<8x288xf32> -> vector<8x288xf32>
    %28 = arith.addf %23, %27 : vector<8x288xf32>
    %c2 = arith.constant 2 : index
    %c0_25 = arith.constant 0 : index
    %c0_26 = arith.constant 0 : index
    %29 = vector.load %arg4[%c2, %c0_25, %c0_26] : memref<9x8x8xbf16, #tpu.memory_space<vmem>>, vector<1x8x8xbf16>
    %30 = vector.shape_cast %29 : vector<1x8x8xbf16> to vector<8x8xbf16>
    %c0_27 = arith.constant 0 : index
    %c2_28 = arith.constant 2 : index
    %31 = vector.load %arg9[%c0_27, %c2_28] : memref<8x342xbf16, #tpu.memory_space<vmem>>, vector<8x288xbf16>
    %cst_29 = arith.constant dense<0.000000e+00> : vector<8x288xf32>
    %32 = tpu.matmul %30, %31, %cst_29 {dimension_numbers = #tpu.dot_dimension_numbers<[1], [0], [0], [1], [0, 0, 1, 1], [], []>} : vector<8x8xbf16>, vector<8x288xbf16>, vector<8x288xf32> -> vector<8x288xf32>
    %33 = arith.addf %28, %32 : vector<8x288xf32>
    %c3 = arith.constant 3 : index
    %c0_30 = arith.constant 0 : index
    %c0_31 = arith.constant 0 : index
    %34 = vector.load %arg4[%c3, %c0_30, %c0_31] : memref<9x8x8xbf16, #tpu.memory_space<vmem>>, vector<1x8x8xbf16>
    %35 = vector.shape_cast %34 : vector<1x8x8xbf16> to vector<8x8xbf16>
    %c0_32 = arith.constant 0 : index
    %c18 = arith.constant 18 : index
    %36 = vector.load %arg9[%c0_32, %c18] : memref<8x342xbf16, #tpu.memory_space<vmem>>, vector<8x288xbf16>
    %cst_33 = arith.constant dense<0.000000e+00> : vector<8x288xf32>
    %37 = tpu.matmul %35, %36, %cst_33 {dimension_numbers = #tpu.dot_dimension_numbers<[1], [0], [0], [1], [0, 0, 1, 1], [], []>} : vector<8x8xbf16>, vector<8x288xbf16>, vector<8x288xf32> -> vector<8x288xf32>
    %38 = arith.addf %33, %37 : vector<8x288xf32>
    %c4 = arith.constant 4 : index
    %c0_34 = arith.constant 0 : index
    %c0_35 = arith.constant 0 : index
    %39 = vector.load %arg4[%c4, %c0_34, %c0_35] : memref<9x8x8xbf16, #tpu.memory_space<vmem>>, vector<1x8x8xbf16>
    %40 = vector.shape_cast %39 : vector<1x8x8xbf16> to vector<8x8xbf16>
    %c0_36 = arith.constant 0 : index
    %c19_37 = arith.constant 19 : index
    %41 = vector.load %arg9[%c0_36, %c19_37] : memref<8x342xbf16, #tpu.memory_space<vmem>>, vector<8x288xbf16>
    %cst_38 = arith.constant dense<0.000000e+00> : vector<8x288xf32>
    %42 = tpu.matmul %40, %41, %cst_38 {dimension_numbers = #tpu.dot_dimension_numbers<[1], [0], [0], [1], [0, 0, 1, 1], [], []>} : vector<8x8xbf16>, vector<8x288xbf16>, vector<8x288xf32> -> vector<8x288xf32>
    %43 = arith.addf %38, %42 : vector<8x288xf32>
    %c5 = arith.constant 5 : index
    %c0_39 = arith.constant 0 : index
    %c0_40 = arith.constant 0 : index
    %44 = vector.load %arg4[%c5, %c0_39, %c0_40] : memref<9x8x8xbf16, #tpu.memory_space<vmem>>, vector<1x8x8xbf16>
    %45 = vector.shape_cast %44 : vector<1x8x8xbf16> to vector<8x8xbf16>
    %c0_41 = arith.constant 0 : index
    %c20 = arith.constant 20 : index
    %46 = vector.load %arg9[%c0_41, %c20] : memref<8x342xbf16, #tpu.memory_space<vmem>>, vector<8x288xbf16>
    %cst_42 = arith.constant dense<0.000000e+00> : vector<8x288xf32>
    %47 = tpu.matmul %45, %46, %cst_42 {dimension_numbers = #tpu.dot_dimension_numbers<[1], [0], [0], [1], [0, 0, 1, 1], [], []>} : vector<8x8xbf16>, vector<8x288xbf16>, vector<8x288xf32> -> vector<8x288xf32>
    %48 = arith.addf %43, %47 : vector<8x288xf32>
    %c6 = arith.constant 6 : index
    %c0_43 = arith.constant 0 : index
    %c0_44 = arith.constant 0 : index
    %49 = vector.load %arg4[%c6, %c0_43, %c0_44] : memref<9x8x8xbf16, #tpu.memory_space<vmem>>, vector<1x8x8xbf16>
    %50 = vector.shape_cast %49 : vector<1x8x8xbf16> to vector<8x8xbf16>
    %c0_45 = arith.constant 0 : index
    %c36 = arith.constant 36 : index
    %51 = vector.load %arg9[%c0_45, %c36] : memref<8x342xbf16, #tpu.memory_space<vmem>>, vector<8x288xbf16>
    %cst_46 = arith.constant dense<0.000000e+00> : vector<8x288xf32>
    %52 = tpu.matmul %50, %51, %cst_46 {dimension_numbers = #tpu.dot_dimension_numbers<[1], [0], [0], [1], [0, 0, 1, 1], [], []>} : vector<8x8xbf16>, vector<8x288xbf16>, vector<8x288xf32> -> vector<8x288xf32>
    %53 = arith.addf %48, %52 : vector<8x288xf32>
    %c7 = arith.constant 7 : index
    %c0_47 = arith.constant 0 : index
    %c0_48 = arith.constant 0 : index
    %54 = vector.load %arg4[%c7, %c0_47, %c0_48] : memref<9x8x8xbf16, #tpu.memory_space<vmem>>, vector<1x8x8xbf16>
    %55 = vector.shape_cast %54 : vector<1x8x8xbf16> to vector<8x8xbf16>
    %c0_49 = arith.constant 0 : index
    %c37 = arith.constant 37 : index
    %56 = vector.load %arg9[%c0_49, %c37] : memref<8x342xbf16, #tpu.memory_space<vmem>>, vector<8x288xbf16>
    %cst_50 = arith.constant dense<0.000000e+00> : vector<8x288xf32>
    %57 = tpu.matmul %55, %56, %cst_50 {dimension_numbers = #tpu.dot_dimension_numbers<[1], [0], [0], [1], [0, 0, 1, 1], [], []>} : vector<8x8xbf16>, vector<8x288xbf16>, vector<8x288xf32> -> vector<8x288xf32>
    %58 = arith.addf %53, %57 : vector<8x288xf32>
    %c8 = arith.constant 8 : index
    %c0_51 = arith.constant 0 : index
    %c0_52 = arith.constant 0 : index
    %59 = vector.load %arg4[%c8, %c0_51, %c0_52] : memref<9x8x8xbf16, #tpu.memory_space<vmem>>, vector<1x8x8xbf16>
    %60 = vector.shape_cast %59 : vector<1x8x8xbf16> to vector<8x8xbf16>
    %c0_53 = arith.constant 0 : index
    %c38 = arith.constant 38 : index
    %61 = vector.load %arg9[%c0_53, %c38] : memref<8x342xbf16, #tpu.memory_space<vmem>>, vector<8x288xbf16>
    %cst_54 = arith.constant dense<0.000000e+00> : vector<8x288xf32>
    %62 = tpu.matmul %60, %61, %cst_54 {dimension_numbers = #tpu.dot_dimension_numbers<[1], [0], [0], [1], [0, 0, 1, 1], [], []>} : vector<8x8xbf16>, vector<8x288xbf16>, vector<8x288xf32> -> vector<8x288xf32>
    %63 = arith.addf %58, %62 : vector<8x288xf32>
    %64 = vector.broadcast %4 : vector<1x288xf32> to vector<8x288xf32>
    %65 = arith.mulf %63, %64 : vector<8x288xf32>
    %cst_55 = arith.constant dense<0.000000e+00> : vector<8xf32>
    %66 = vector.multi_reduction <add>, %65, %cst_55 [1] : vector<8x288xf32> to vector<8xf32>
    %67 = vector.shape_cast %66 : vector<8xf32> to vector<8x1xf32>
    %c0_56 = arith.constant 0 : index
    %c0_57 = arith.constant 0 : index
    %c0_58 = arith.constant 0 : index
    %68 = vector.load %arg7[%c0_56, %c0_57, %c0_58] : memref<1x8x1xf32, #tpu.memory_space<vmem>>, vector<1x8x1xf32>
    %69 = vector.shape_cast %68 : vector<1x8x1xf32> to vector<8x1xf32>
    %70 = vector.shape_cast %67 : vector<8x1xf32> to vector<1x8x1xf32>
    tpu.vector_store %arg7[%c0_56, %c0_57, %c0_58], %70 {strides = array<i32>} : memref<1x8x1xf32, #tpu.memory_space<vmem>>, vector<1x8x1xf32>,
    %71 = arith.mulf %65, %63 : vector<8x288xf32>
    %cst_59 = arith.constant dense<0.000000e+00> : vector<8xf32>
    %72 = vector.multi_reduction <add>, %71, %cst_59 [1] : vector<8x288xf32> to vector<8xf32>
    %73 = vector.shape_cast %72 : vector<8xf32> to vector<8x1xf32>
    %c0_60 = arith.constant 0 : index
    %c0_61 = arith.constant 0 : index
    %c0_62 = arith.constant 0 : index
    %74 = vector.load %arg8[%c0_60, %c0_61, %c0_62] : memref<1x8x1xf32, #tpu.memory_space<vmem>>, vector<1x8x1xf32>
    %75 = vector.shape_cast %74 : vector<1x8x1xf32> to vector<8x1xf32>
    %76 = vector.shape_cast %73 : vector<8x1xf32> to vector<1x8x1xf32>
    tpu.vector_store %arg8[%c0_60, %c0_61, %c0_62], %76 {strides = array<i32>} : memref<1x8x1xf32, #tpu.memory_space<vmem>>, vector<1x8x1xf32>,
    %c0_63 = arith.constant 0 : index
    %c0_64 = arith.constant 0 : index
    %c0_65 = arith.constant 0 : index
    %77 = vector.load %arg6[%c0_63, %c0_64, %c0_65] : memref<1x8x288xf32, #tpu.memory_space<vmem>>, vector<1x8x288xf32>
    %78 = vector.shape_cast %77 : vector<1x8x288xf32> to vector<8x288xf32>
    %79 = vector.shape_cast %63 : vector<8x288xf32> to vector<1x8x288xf32>
    tpu.vector_store %arg6[%c0_63, %c0_64, %c0_65], %79 {strides = array<i32>} : memref<1x8x288xf32, #tpu.memory_space<vmem>>, vector<1x8x288xf32>,
    return
  }
  func.func @transform_0(%arg0: i32) -> (i32, i32, i32) {
    %c0_i32 = arith.constant 0 : i32
    %c0_i32_0 = arith.constant 0 : i32
    %c0_i32_1 = arith.constant 0 : i32
    return %arg0, %c0_i32, %c0_i32_0 : i32, i32, i32
  }
  func.func @transform_1(%arg0: i32) -> (i32, i32) {
    %c0_i32 = arith.constant 0 : i32
    %c0_i32_0 = arith.constant 0 : i32
    %c0_i32_1 = arith.constant 0 : i32
    return %c0_i32, %c0_i32_0 : i32, i32
  }
  func.func @transform_2(%arg0: i32) -> (i32, i32) {
    %c0_i32 = arith.constant 0 : i32
    %c0_i32_0 = arith.constant 0 : i32
    %c0_i32_1 = arith.constant 0 : i32
    return %c0_i32, %c0_i32_0 : i32, i32
  }
  func.func @transform_3(%arg0: i32) -> (i32, i32, i32) {
    %c0_i32 = arith.constant 0 : i32
    %c0_i32_0 = arith.constant 0 : i32
    %c0_i32_1 = arith.constant 0 : i32
    %c0_i32_2 = arith.constant 0 : i32
    return %c0_i32, %c0_i32_0, %c0_i32_1 : i32, i32, i32
  }
  func.func @transform_4(%arg0: i32) -> (i32, i32) {
    %c0_i32 = arith.constant 0 : i32
    %c0_i32_0 = arith.constant 0 : i32
    %c0_i32_1 = arith.constant 0 : i32
    return %c0_i32, %c0_i32_0 : i32, i32
  }
  func.func @transform_5(%arg0: i32) -> (i32, i32, i32) {
    %c0_i32 = arith.constant 0 : i32
    %c0_i32_0 = arith.constant 0 : i32
    %c0_i32_1 = arith.constant 0 : i32
    return %arg0, %c0_i32, %c0_i32_0 : i32, i32, i32
  }
  func.func @transform_6(%arg0: i32) -> (i32, i32, i32) {
    %c0_i32 = arith.constant 0 : i32
    %c0_i32_0 = arith.constant 0 : i32
    %c0_i32_1 = arith.constant 0 : i32
    return %arg0, %c0_i32, %c0_i32_0 : i32, i32, i32
  }
  func.func @transform_7(%arg0: i32) -> (i32, i32, i32) {
    %c0_i32 = arith.constant 0 : i32
    %c0_i32_0 = arith.constant 0 : i32
    %c0_i32_1 = arith.constant 0 : i32
    return %arg0, %c0_i32, %c0_i32_0 : i32, i32, i32
  }
}

</mosaic_0001>

<bundles_post_ra>
// kernel: up_forward.5
= control target key start
LH: loop header
LB: loop body
LE: loop exit
PB: predicated region body
PF: predicated region fallthrough
CT: control target
= control target key end

     0   :  { %8 = vsyncpa [#allocation3], 0  ;;  %s837_s0 = inlined_call_operand.hbm [shape: f32[2,8,288], index: 0, kind: input, shape index: {}, may-alias: {0,3}]   ;;  %s838_s1 = inlined_call_operand.hbm [shape: f32[8,1], index: 1, kind: input, shape index: {}]   ;;  %s839_s2 = inlined_call_operand.hbm [shape: f32[8,1], index: 2, kind: input, shape index: {}]   ;;  %s840_s3 = inlined_call_operand.hbm [shape: f32[2,8,288], index: 3, kind: output, shape index: {}, may-alias: {0,3}]  }
   0x1   :  { %10 = vsyncpa [#allocation3 + $0x1], 0 }
   0x2   :  { %11 = vsyncpa [#allocation6], 0 }
   0x3   :  { %12 = vsyncpa [#allocation4], 0 }
   0x4   :  { %14 = vsyncpa [#allocation4 + $0x1], 0  ;;  %s612_s12 = smov 0   ;;  %s614_s13 = smov 0  }
   0x5   :  { %s616_s14 = smov 0   ;;  %s618_s15 = smov 0  }
   0x6 LB: > { %s633_s16 = sadd.s32 4294967295, %s585_s15   ;;  %s344_s17 = sadd.s32 4294967294, %s585_s15   ;;  %s585_s15 = sphi %s618_s15, %s860_s15   ;;  %s581_s14 = sphi %s616_s14, %s859_s14   ;;  %s577_s13 = sphi %s614_s13, %s858_s13   ;;  %s573_s12 = sphi %s612_s12, %s857_s12  }
   0x7   : > { %p40_p0 = scmp.ne.s32.totalorder %s577_s13, %s573_s12  ;;  %p841_p1 = scmp.eq.s32.totalorder %s633_s16, 0 }
   0x8   : > { %p112_p3 = scmp.eq.s32.totalorder %s344_s17, 1  ;;  %p345_p5 = scmp.ge.s32.totalorder %s585_s15, 1 }
   0x9   : > { %p642_p4 = por %p841_p1, %p40_p0  ;;  %p119_p7 = scmp.lt.s32.totalorder %s585_s15, 3 }
   0xa   : > { %p647_p6 = por %p112_p3, %p40_p0  ;;  %s587_s21 = smov [#allocation5]  }
   0xb   : > { %s844_s18 = scalar_select %p642_p4, 1, 0 }
   0xc   : > { %s845_s19 = scalar_select %p647_p6, 1, 0 }
   0xd   : > { %p652_p8 = pnand %p345_p5, %p119_p7  ;;  %s132_s22 = sshll.u32 %s587_s21, 4  ;;  %s133_s22 = int_to_ptr.vmem [resolvable:$true] %s132_s22 }
   0xe   : > { %s588_s23 = smov [#allocation7]   ;;  %s668_s26 = sadd.s32 1, %s585_s15  }
   0xf   : > { %s846_s20 = scalar_select %p652_p8, 1, 0 }
  0x10   : > { %p372_p10 = pneg %p652_p8  ;;  %s143_s24 = sshll.u32 %s588_s23, 4  ;;  %s665_s24 = int_to_ptr.vmem [resolvable:$true] %s143_s24 }
  0x11   : > { %s24_s27 = ssub.s32 %s585_s15, %s668_s26  ;;  %s429_s30 = scalar_lea.hbm %s838_s1, 128 }
  0x12   : > { %p661_p11 = pnand %p372_p10, %p841_p1  ;;  %p430_p12 = scmp.ne.s32.totalorder %s838_s1, %s429_s30 }
  0x13   : > { %p436_p5 = scmp.lt.u32.totalorder %s429_s30, %s838_s1 }
  0x14   : > { %p431_p13 = pneg %p661_p11 }
  0x16   : > { %p432_p0 = pnand %p431_p13, %p430_p12 }
  0x18   : > { %p433_p3 = pneg %p432_p0 }
  0x1a   : > { %p438_p7 = pnand %p436_p5, %p433_p3 }
  0x1c   : > { %441 = shalt.err (!%p438_p7)
}
  0x1d   : > { %s442_s8 = scalar_lea.vmem %s133_s22, 128  ;;  %p450_p2 = scmp.lt.s32.totalorder %s133_s22, %s133_s22 }
  0x1e   : > { %p443_p10 = scmp.ne.s32.totalorder %s133_s22, %s442_s8  ;;  %p451_p6 = scmp.lt.s32.totalorder %s442_s8, %s442_s8 }
  0x20   : > { %p445_p9 = pnand %p443_p10, %p431_p13  ;;  %p452_p4 = por %p451_p6, %p450_p2 }
  0x22   : > { %p446_p1 = pneg %p445_p9 }
  0x24   : > { %p453_p8 = pnand %p452_p4, %p446_p1 }
  0x26   : > { %456 = shalt.err (!%p453_p8)
}
  0x27   : > { %375 = dma.hbm_to_vmem [thread:$0]  (!%p661_p11), %s838_s1, 128, %s133_s22, [#allocation6]  }
  0x28   : > { %s457_s21 = scalar_lea.hbm %s839_s2, 128 }
  0x29   : > { %p458_p9 = scmp.ne.s32.totalorder %s839_s2, %s457_s21  ;;  %p464_p4 = scmp.lt.u32.totalorder %s457_s21, %s839_s2 }
  0x2b   : > { %p460_p2 = pnand %p458_p9, %p431_p13 }
  0x2d   : > { %p461_p1 = pneg %p460_p2 }
  0x2f   : > { %p466_p6 = pnand %p464_p4, %p461_p1 }
  0x31   : > { %469 = shalt.err (!%p466_p6)
}
  0x32   : > { %s470_s22 = scalar_lea.vmem %s665_s24, 128  ;;  %p478_p3 = scmp.lt.s32.totalorder %s665_s24, %s665_s24 }
  0x33   : > { %p471_p8 = scmp.ne.s32.totalorder %s665_s24, %s470_s22  ;;  %p479_p5 = scmp.lt.s32.totalorder %s470_s22, %s470_s22 }
  0x35   : > { %p473_p12 = pnand %p471_p8, %p431_p13  ;;  %p480_p7 = por %p479_p5, %p478_p3 }
  0x37   : > { %p474_p0 = pneg %p473_p12 }
  0x39   : > { %p481_p10 = pnand %p480_p7, %p474_p0 }
  0x3b   : > { %484 = shalt.err (!%p481_p10)
}
  0x3c   : > { %378 = dma.hbm_to_vmem [thread:$0]  (!%p661_p11), %s839_s2, 128, %s665_s24, [#allocation6]  }
  0x3d   : > { %p25_p13 = scmp.eq.s32.totalorder %s24_s27, 0  ;;  %s27_s6 = sadd.s32 1, %s581_s14 }
  0x3e   : > { %p34_p9 = scmp.ne.s32.totalorder %s581_s14, %s577_s13  ;;  %p35_p2 = scmp.eq.s32.totalorder %s585_s15, 0 }
  0x3f   : > { %s727_s25 = scalar_select %p25_p13, %s581_s14, %s27_s6  }
  0x40   : > { %p36_p1 = por %p35_p2, %p34_p9  ;;  %p848_p4 = scmp.eq.s32.totalorder %s633_s16, 1 }
  0x41   : > { %p389_p8 = scmp.lt.s32.totalorder %s585_s15, 2  ;;  %s154_s8 = sand.u32 1, %s581_s14  }
  0x42   : > { %p731_p6 = por %p848_p4, %p34_p9  ;;  %s356_s9 = smul.u32 24, %s154_s8 }
  0x43   : > { %s357_s10 = smul.u32 384, %s585_s15  ;;  %p738_p12 = pnand %p389_p8, %p36_p1 }
  0x44   : > { %s158_s21 = scalar_lea.vmem [#allocation2], %s356_s9  ;;  %s155_s28 = scalar_lea.sflag [#allocation3], %s154_s8 }
  0x45   : > { %s745_s17 = scalar_lea.hbm %s837_s0, %s357_s10  ;;  %s166_s23 = sshll.u32 %s158_s21, 4  ;;  %s747_s23 = int_to_ptr.vmem [resolvable:$true] %s166_s23 }
  0x46   : > { %s485_s29 = scalar_lea.hbm %s745_s17, 384  ;;  %p487_p0 = pneg %p738_p12 }
  0x47   : > { %p486_p11 = scmp.ne.s32.totalorder %s745_s17, %s485_s29  ;;  %s490_s4 = scalar_lea.hbm %s837_s0, 768 }
  0x48   : > { %p491_p7 = scmp.lt.u32.totalorder %s745_s17, %s837_s0  ;;  %p492_p10 = scmp.lt.u32.totalorder %s490_s4, %s485_s29 }
  0x49   : > { %p488_p3 = pnand %p487_p0, %p486_p11  ;;  %p494_p9 = scmp.lt.u32.totalorder %s485_s29, %s745_s17 }
  0x4a   : > { %p493_p13 = por %p492_p10, %p491_p7 }
  0x4b   : > { %p489_p5 = pneg %p488_p3 }
  0x4c   : > { %p495_p2 = por %p494_p9, %p493_p13 }
  0x4e   : > { %p496_p1 = pnand %p495_p2, %p489_p5 }
  0x50   : > { %499 = shalt.err (!%p496_p1)
}
  0x51   : > { %s500_s8 = scalar_lea.vmem %s747_s23, 384  ;;  %s589_s9 = smov [#allocation2]  }
  0x52   : > { %p501_p4 = scmp.ne.s32.totalorder %s747_s23, %s500_s8  ;;  %s505_s10 = sshll.u32 %s589_s9, 4  ;;  %s506_s10 = int_to_ptr.vmem [resolvable:$false] %s505_s10 }
  0x53   : > { %s507_s24 = scalar_lea.vmem %s506_s10, 768  ;;  %p508_p3 = scmp.lt.s32.totalorder %s747_s23, %s506_s10 }
  0x54   : > { %p503_p8 = pnand %p501_p4, %p487_p0  ;;  %p509_p7 = scmp.lt.s32.totalorder %s507_s24, %s500_s8 }
  0x56   : > { %p504_p11 = pneg %p503_p8  ;;  %p510_p10 = por %p509_p7, %p508_p3 }
  0x58   : > { %p511_p13 = pnand %p510_p10, %p504_p11 }
  0x5a   : > { %514 = shalt.err (!%p511_p13)
}
  0x5b   : > { %382 = dma.hbm_to_vmem [thread:$0]  (!%p738_p12), %s745_s17, 384, %s747_s23, %s155_s28  }
  0x5c   : > { %p851_p5 = scmp.ne.s32.totalorder %s846_s20, 0 }
  0x5d   : > { %s777_s27 = sand.u32 (!%p851_p5), 1, %s577_s13   ;;  %p852_p0 = scmp.ne.s32.totalorder (!%p851_p5), %s844_s18, 0 }
  0x5e   : > { %175 = sbr.rel (%p851_p5) target bundleno = 258 (0x102), region = 32  ;;  %s178_s29 = scalar_lea.sflag (!%p851_p5), [#allocation3], %s777_s27 }
  0x5f   : > { %s358_s21 = smul.u32 (!%p851_p5), 24, %s777_s27 }
  0x61   : > { %s181_s30 = scalar_lea.vmem (!%p851_p5), [#allocation2], %s358_s21 }
  0x65   : > { %560 = dma.done.wait (%p852_p0), %s178_s29, 384  }
  0x66   : > { %562 = vsyncadd (%p852_p0), %s178_s29, 4294966912  ;;  %p853_p9 = scmp.eq.s32.totalorder %s633_s16, 0 }
  0x68   : > { %564 = dma.done.wait (%p853_p9), [#allocation6], 256   ;;  %p854_p12 = pmov %p853_p9 }
  0x69   : > { %v590_v0 = vmov 0   ;;  %v215_v1 = vld [vmem:[#allocation5] sm:$0xff]  ;;  %v224_v2 = vld [vmem:[#allocation7] sm:$0xff]  ;;  %v213_v5 = vld [vmem:[%s181_s30 + $0x8] sm:$0xff]  ;;  %s359_s18 = smul.u32 384, %s633_s16  ;;  %s211_s20 = scalar_lea.vmem [#allocation8], %s358_s21 }
  0x6a   : > { %566 = vsyncadd (%p854_p12), [#allocation6], 4294967040  ;;  %428 = vset.pattern.permute.xlu0 %v590_v0  ;;  %v212_v4 = vld [vmem:[%s181_s30] sm:$0xff]  ;;  %v214_v6 = vld [vmem:[%s181_s30 + $0x10] sm:$0xff]  ;;  %s255_s11 = sshll.u32 %s211_s20, 4  ;;  %vm238_vm0 = vcmask 261120   ;;  %s795_s11 = int_to_ptr.vmem [resolvable:$true] %s255_s11 }
  0x6b   : > { %218 = vperm.xlu0 %428, %v215_v1   ;;  %s793_s28 = scalar_lea.hbm %s840_s3, %s359_s18  ;;  %s241_s16 = scalar_lea.sflag [#allocation4], %s777_s27 }
  0x6c   : > { %s515_s22 = scalar_lea.vmem %s795_s11, 384  ;;  %s591_s4 = smov [#allocation8]  }
  0x6d   : > { %p516_p2 = scmp.ne.s32.totalorder %s795_s11, %s515_s22  ;;  %s519_s5 = sshll.u32 %s591_s4, 4  ;;  %s520_s5 = int_to_ptr.vmem [resolvable:$false] %s519_s5 }
  0x6e   : > { %s521_s6 = scalar_lea.vmem %s520_s5, 768  ;;  %p522_p8 = scmp.lt.s32.totalorder %s795_s11, %s520_s5 }
  0x6f   : > { %227 = vperm.xlu0 %428, %v224_v2   ;;  %p517_p1 = pnand %p516_p2, %p731_p6  ;;  %p523_p11 = scmp.lt.s32.totalorder %s521_s6, %s515_s22 }
  0x71   : > { %p518_p4 = pneg %p517_p1  ;;  %p524_p3 = por %p523_p11, %p522_p8 }
  0x73   : > { %p525_p7 = pnand %p524_p3, %p518_p4 }
  0xea   : > { %v219_v3 = vpop.permute.xlu0 %218 }
  0xeb   : > { %v221_v7 = vmul.f32 %v219_v3, %v212_v4  ;;  %v222_v8 = vmul.f32 %v219_v3, %v213_v5  ;;  %v223_v9 = vmul.f32 %v219_v3, %v214_v6 }
  0xee   : > { %v228_v10 = vpop.permute.xlu0 %227 }
  0xef   : > { %v230_v11 = vadd.f32 %v228_v10, %v221_v7  ;;  %v231_v12 = vadd.f32 %v228_v10, %v222_v8  ;;  %v232_v13 = vadd.f32 %v228_v10, %v223_v9 }
  0xf1   : > { %v233_v14 = vmax.f32 %v230_v11, 0.0  ;;  %v234_v15 = vmax.f32 %v231_v12, 0.0  ;;  %v235_v16 = vmax.f32 %v232_v13, 0.0 }
  0xf3   : > { %236 = vst [vmem:[%s211_s20] sm:$0xff] %v233_v14  ;;  %237 = vst [vmem:[%s211_s20 + $0x8] sm:$0xff] %v234_v15 }
  0xf4   : > { %239 = vst.msk [vmem:[%s211_s20 + $0x10] sm:$0xff] %vm238_vm0, %v235_v16 }
  0xf5   : > { %528 = shalt.err (!%p525_p7)
}
  0xf6   : > { %s529_s8 = scalar_lea.hbm %s793_s28, 384  ;;  %s533_s24 = scalar_lea.hbm %s840_s3, 768 }
  0xf7   : > { %p530_p10 = scmp.ne.s32.totalorder %s793_s28, %s529_s8  ;;  %p534_p0 = scmp.lt.u32.totalorder %s793_s28, %s840_s3 }
  0xf8   : > { %p535_p9 = scmp.lt.u32.totalorder %s533_s24, %s529_s8  ;;  %p537_p2 = scmp.lt.u32.totalorder %s529_s8, %s793_s28 }
  0xf9   : > { %p531_p13 = pnand %p530_p10, %p731_p6 }
  0xfa   : > { %p536_p12 = por %p535_p9, %p534_p0 }
  0xfb   : > { %p532_p5 = pneg %p531_p13 }
  0xfc   : > { %p538_p1 = por %p537_p2, %p536_p12 }
  0xfe   : > { %p539_p4 = pnand %p538_p1, %p532_p5 }
 0x100   : > { %542 = shalt.err (!%p539_p4)
}
 0x101   : > { %370 = dma.vmem_to_hbm [thread:$0]  (%p731_p6), %s795_s11, 384, %s793_s28, %s241_s16  }
 0x102 PF: > { %s267_s29 = sand.u32 1, %s573_s12   ;;  %p855_p8 = scmp.ne.s32.totalorder %s845_s19, 0 }
 0x103   : > { %p856_p11 = scmp.ge.s32.totalorder %s585_s15, 2  ;;  %s268_s30 = scalar_lea.sflag [#allocation4], %s267_s29 }
 0x105   : > { %p384_p3 = pnand %p856_p11, %p855_p8 }
 0x107   : > { %568 = dma.done.wait (!%p384_p3), %s268_s30, 384  }
 0x108   : > { %570 = vsyncadd (!%p384_p3), %s268_s30, 4294966912  ;;  %p17_p7 = scmp.ge.s32.totalorder %s668_s26, 4   ;;  %s857_s12 = smov %s577_s13 }
 0x109   : > { %s858_s13 = smov %s581_s14  ;;  %s859_s14 = smov %s727_s25 }
 0x10a   : > { %s860_s15 = smov %s668_s26  ;;  %19 = sbr.rel (!%p17_p7) target bundleno = 6 (0x6), region = 85 }
 0x111   :  { %273 = vsyncpa [#allocation3], 1 }
 0x112   :  { %275 = vsyncpa [#allocation3 + $0x1], 1 }
 0x113   :  { %276 = vsyncpa [#allocation6], 1 }
 0x114   :  { %277 = vsyncpa [#allocation4], 1 }
 0x115   :  { %279 = vsyncpa [#allocation4 + $0x1], 1 }

// kernel: up_forward.3
= control target key start
LH: loop header
LB: loop body
LE: loop exit
PB: predicated region body
PF: predicated region fallthrough
CT: control target
= control target key end

     0   :  { %s2704_s0 = inlined_call_operand.hbm [shape: bf16[2,4,288], index: 0, kind: input, shape index: {}]   ;;  %s2705_s1 = inlined_call_operand.hbm [shape: bf16[2,4,288], index: 1, kind: input, shape index: {}]   ;;  %s2706_s2 = inlined_call_operand.hbm [shape: bf16[9,8,8], index: 2, kind: input, shape index: {}]   ;;  %s2707_s3 = inlined_call_operand.hbm [shape: f32[1,288], index: 3, kind: input, shape index: {}]   ;;  %s2708_s4 = inlined_call_operand.hbm [shape: bf16[2,8,288], index: 4, kind: output, shape index: {0}]   ;;  %s2709_s5 = inlined_call_operand.hbm [shape: f32[2,8,1], index: 5, kind: output, shape index: {1}]   ;;  %s2710_s6 = inlined_call_operand.hbm [shape: f32[2,8,1], index: 6, kind: output, shape index: {2}]  }
   0x1   :  { %2717 = sst [smem:[#allocation21_spill]] %s2704_s0 }
   0x2   :  { %12 = vsyncpa [#allocation4], 0 }
   0x3   :  { %14 = vsyncpa [#allocation4 + $0x1], 0 }
   0x4   :  { %15 = vsyncpa [#allocation7], 0 }
   0x5   :  { %17 = vsyncpa [#allocation7 + $0x1], 0 }
   0x6   :  { %18 = vsyncpa [#allocation10], 0 }
   0x7   :  { %19 = vsyncpa [#allocation5], 0 }
   0x8   :  { %21 = vsyncpa [#allocation5 + $0x1], 0 }
   0x9   :  { %22 = vsyncpa [#allocation13], 0 }
   0xa   :  { %24 = vsyncpa [#allocation13 + $0x1], 0  ;;  %s2268_s21 = smov 0   ;;  %s2270_s22 = smov 0  }
   0xb   :  { %s2272_s23 = smov 0   ;;  %s2274_s24 = smov 0  }
   0xc LB: > { %s2289_s25 = sadd.s32 4294967295, %s2209_s24   ;;  %s2712_s26 = sadd.s32 4294967294, %s2209_s24   ;;  %s2209_s24 = sphi %s2274_s24, %s2741_s24   ;;  %s2205_s23 = sphi %s2272_s23, %s2740_s23   ;;  %s2201_s22 = sphi %s2270_s22, %s2739_s22   ;;  %s2197_s21 = sphi %s2268_s21, %s2738_s21  }
   0xd   : > { %p50_p0 = scmp.ne.s32.totalorder %s2201_s22, %s2197_s21  ;;  %p2711_p1 = scmp.eq.s32.totalorder %s2289_s25, 0 }
   0xe   : > { %p148_p3 = scmp.eq.s32.totalorder %s2712_s26, 1  ;;  %p1658_p5 = scmp.ge.s32.totalorder %s2209_s24, 1 }
   0xf   : > { %p2300_p4 = por %p2711_p1, %p50_p0  ;;  %p207_p7 = scmp.lt.s32.totalorder %s2209_s24, 3 }
  0x10   : > { %p2305_p6 = por %p148_p3, %p50_p0  ;;  %s2211_s30 = smov [#allocation8]  }
  0x11   : > { %s2718_s27 = scalar_select %p2300_p4, 1, 0 }
  0x12   : > { %s2719_s28 = scalar_select %p2305_p6, 1, 0 }
  0x13   : > { %p2310_p8 = pnand %p1658_p5, %p207_p7  ;;  %s219_s7 = sshll.u32 %s2211_s30, 4  ;;  %s2314_s7 = int_to_ptr.vmem [resolvable:$true] %s219_s7 }
  0x14   : > { %s2212_s9 = smov [#allocation9]   ;;  %s1955_s13 = scalar_lea.hbm %s2706_s2, 576 }
  0x15   : > { %s2720_s29 = scalar_select %p2310_p8, 1, 0 }
  0x16   : > { %p1871_p9 = pneg %p2310_p8  ;;  %s233_s10 = sshll.u32 %s2212_s9, 4  ;;  %s2325_s10 = int_to_ptr.vmem [resolvable:$true] %s233_s10 }
  0x17   : > { %p1956_p12 = scmp.ne.s32.totalorder %s2706_s2, %s1955_s13  ;;  %p1962_p5 = scmp.lt.u32.totalorder %s1955_s13, %s2706_s2 }
  0x18   : > { %p2321_p11 = pnand %p1871_p9, %p2711_p1 }
  0x1a   : > { %p1957_p13 = pneg %p2321_p11 }
  0x1c   : > { %p1958_p0 = pnand %p1957_p13, %p1956_p12 }
  0x1e   : > { %p1959_p3 = pneg %p1958_p0 }
  0x20   : > { %p1964_p7 = pnand %p1962_p5, %p1959_p3 }
  0x22   : > { %1967 = shalt.err (!%p1964_p7)
}
  0x23   : > { %s1968_s18 = scalar_lea.vmem %s2314_s7, 576  ;;  %p1976_p2 = scmp.lt.s32.totalorder %s2314_s7, %s2314_s7 }
  0x24   : > { %p1969_p9 = scmp.ne.s32.totalorder %s2314_s7, %s1968_s18  ;;  %p1977_p12 = scmp.lt.s32.totalorder %s1968_s18, %s1968_s18 }
  0x26   : > { %p1971_p10 = pnand %p1969_p9, %p1957_p13  ;;  %p1978_p0 = por %p1977_p12, %p1976_p2 }
  0x28   : > { %p1972_p1 = pneg %p1971_p10 }
  0x2a   : > { %p1979_p6 = pnand %p1978_p0, %p1972_p1 }
  0x2c   : > { %1982 = shalt.err (!%p1979_p6)
}
  0x2d   : > { %s2213_s19 = smov 64   ;;  %s2214_s20 = smov 4  }
  0x2e   : > { %1874 = dma.hbm_to_vmem [thread:$0]  (!%p2321_p11), %s2706_s2, 576, %s2314_s7, [#allocation7], %s2213_s19, %s2213_s19, %s2214_s20  }
  0x2f   : > { %s1983_s13 = scalar_lea.hbm %s2707_s3, 48 }
  0x30   : > { %p1984_p2 = scmp.ne.s32.totalorder %s2707_s3, %s1983_s13  ;;  %p1990_p10 = scmp.lt.u32.totalorder %s1983_s13, %s2707_s3 }
  0x32   : > { %p1986_p1 = pnand %p1984_p2, %p1957_p13 }
  0x34   : > { %p1987_p6 = pneg %p1986_p1 }
  0x36   : > { %p1992_p3 = pnand %p1990_p10, %p1987_p6 }
  0x38   : > { %1995 = shalt.err (!%p1992_p3)
}
  0x39   : > { %s1996_s7 = scalar_lea.vmem %s2325_s10, 48  ;;  %s2003_s18 = scalar_lea.vmem %s2325_s10, 64 }
  0x3a   : > { %p1997_p5 = scmp.ne.s32.totalorder %s2325_s10, %s1996_s7  ;;  %p2004_p12 = scmp.lt.s32.totalorder %s2325_s10, %s2325_s10 }
  0x3b   : > { %p2005_p0 = scmp.lt.s32.totalorder %s2003_s18, %s1996_s7 }
  0x3c   : > { %p1999_p7 = pnand %p1997_p5, %p1957_p13 }
  0x3d   : > { %p2006_p2 = por %p2005_p0, %p2004_p12 }
  0x3e   : > { %p2000_p9 = pneg %p1999_p7 }
  0x40   : > { %p2007_p1 = pnand %p2006_p2, %p2000_p9 }
  0x42   : > { %2010 = shalt.err (!%p2007_p1)
}
  0x43   : > { %1877 = dma.hbm_to_vmem [thread:$0]  (!%p2321_p11), %s2707_s3, 48, %s2325_s10, [#allocation10]  }
  0x44   : > { %s2381_s30 = sadd.s32 1, %s2209_s24   ;;  %s37_s8 = sadd.s32 1, %s2205_s23 }
  0x45   : > { %s34_s9 = ssub.s32 %s2209_s24, %s2381_s30  ;;  %p44_p13 = scmp.ne.s32.totalorder %s2205_s23, %s2201_s22 }
  0x46   : > { %p35_p6 = scmp.eq.s32.totalorder %s34_s9, 0  ;;  %p45_p10 = scmp.eq.s32.totalorder %s2209_s24, 0 }
  0x47   : > { %p2722_p3 = scmp.eq.s32.totalorder %s2289_s25, 1  ;;  %p1897_p7 = scmp.lt.s32.totalorder %s2209_s24, 2 }
  0x48   : > { %s2397_s12 = scalar_select %p35_p6, %s2205_s23, %s37_s8  }
  0x49   : > { %p2391_p5 = por %p2722_p3, %p44_p13  ;;  %p46_p9 = por %p45_p10, %p44_p13 }
  0x4a   : > { %s244_s13 = sand.u32 1, %s2205_s23   ;;  %s2713_s14 = smul.u32 96, %s2209_s24 }
  0x4b   : > { %s2723_s11 = scalar_select %p2391_p5, 1, 0 }
  0x4c   : > { %s2400_s10 = smul.u32 6, %s244_s13  ;;  %p2403_p11 = pnand %p1897_p7, %p46_p9 }
  0x4d   : > { %s2725_s0 = sld [smem:[#allocation21_spill]]  ;;  %s245_s8 = scalar_lea.sflag [#allocation4], %s244_s13 }
  0x4e   : > { %s248_s19 = scalar_lea.vmem [#allocation3], %s2400_s10  ;;  %p2013_p0 = pneg %p2403_p11 }
  0x4f   : > { %s256_s20 = sshll.u32 %s248_s19, 4  ;;  %s2416_s20 = int_to_ptr.vmem [resolvable:$true] %s256_s20 }
  0x53   : > { %s2413_s18 = scalar_lea.hbm %s2725_s0, %s2713_s14  ;;  %s2016_s26 = scalar_lea.hbm %s2725_s0, 192 }
  0x54   : > { %s2011_s9 = scalar_lea.hbm %s2413_s18, 96  ;;  %p2017_p13 = scmp.lt.u32.totalorder %s2413_s18, %s2725_s0 }
  0x55   : > { %p2012_p12 = scmp.ne.s32.totalorder %s2413_s18, %s2011_s9  ;;  %p2018_p6 = scmp.lt.u32.totalorder %s2016_s26, %s2011_s9 }
  0x56   : > { %p2020_p3 = scmp.lt.u32.totalorder %s2011_s9, %s2413_s18 }
  0x57   : > { %p2014_p2 = pnand %p2013_p0, %p2012_p12  ;;  %p2019_p10 = por %p2018_p6, %p2017_p13 }
  0x59   : > { %p2015_p1 = pneg %p2014_p2  ;;  %p2021_p7 = por %p2020_p3, %p2019_p10 }
  0x5b   : > { %p2022_p9 = pnand %p2021_p7, %p2015_p1 }
  0x5d   : > { %2025 = shalt.err (!%p2022_p9)
}
  0x5e   : > { %s2026_s13 = scalar_lea.vmem %s2416_s20, 96  ;;  %s2215_s19 = smov [#allocation3]  }
  0x5f   : > { %p2027_p12 = scmp.ne.s32.totalorder %s2416_s20, %s2026_s13  ;;  %s2031_s17 = sshll.u32 %s2215_s19, 4  ;;  %s2032_s17 = int_to_ptr.vmem [resolvable:$false] %s2031_s17 }
  0x60   : > { %s2033_s14 = scalar_lea.vmem %s2032_s17, 192  ;;  %p2034_p4 = scmp.lt.s32.totalorder %s2416_s20, %s2032_s17 }
  0x61   : > { %p2029_p2 = pnand %p2027_p12, %p2013_p0  ;;  %p2035_p13 = scmp.lt.s32.totalorder %s2033_s14, %s2026_s13 }
  0x63   : > { %p2030_p5 = pneg %p2029_p2  ;;  %p2036_p6 = por %p2035_p13, %p2034_p4 }
  0x65   : > { %p2037_p10 = pnand %p2036_p6, %p2030_p5 }
  0x67   : > { %2040 = shalt.err (!%p2037_p10)
}
  0x68   : > { %1881 = dma.hbm_to_vmem [thread:$0]  (!%p2403_p11), %s2413_s18, 96, %s2416_s20, %s245_s8  }
  0x69   : > { %s2726_s26 = smul.u32 96, %s2209_s24  ;;  %s267_s13 = scalar_lea.vmem [#allocation6], %s2400_s10 }
  0x6a   : > { %s275_s19 = sshll.u32 %s267_s13, 4  ;;  %s2727_s17 = sand.u32 1, %s2209_s24   ;;  %s276_s19 = int_to_ptr.vmem [resolvable:$true] %s275_s19 }
  0x6b   : > { %s2448_s7 = scalar_lea.hbm %s2705_s1, %s2726_s26  ;;  %s264_s14 = scalar_lea.sflag [#allocation7], %s2727_s17 }
  0x6c   : > { %s2041_s0 = scalar_lea.hbm %s2448_s7, 96  ;;  %s2046_s8 = scalar_lea.hbm %s2705_s1, 192 }
  0x6d   : > { %p2042_p4 = scmp.ne.s32.totalorder %s2448_s7, %s2041_s0  ;;  %p2047_p3 = scmp.lt.u32.totalorder %s2448_s7, %s2705_s1 }
  0x6e   : > { %p2048_p7 = scmp.lt.u32.totalorder %s2046_s8, %s2041_s0  ;;  %p2050_p12 = scmp.lt.u32.totalorder %s2041_s0, %s2448_s7 }
  0x6f   : > { %p2044_p5 = pnand %p2042_p4, %p2013_p0 }
  0x70   : > { %p2049_p9 = por %p2048_p7, %p2047_p3 }
  0x71   : > { %p2045_p1 = pneg %p2044_p5 }
  0x72   : > { %p2051_p2 = por %p2050_p12, %p2049_p9 }
  0x74   : > { %p2052_p13 = pnand %p2051_p2, %p2045_p1 }
  0x76   : > { %2055 = shalt.err (!%p2052_p13)
}
  0x77   : > { %s2056_s10 = scalar_lea.vmem %s276_s19, 96  ;;  %s2216_s9 = smov [#allocation6]  }
  0x78   : > { %p2057_p6 = scmp.ne.s32.totalorder %s276_s19, %s2056_s10  ;;  %s2061_s13 = sshll.u32 %s2216_s9, 4  ;;  %s2062_s13 = int_to_ptr.vmem [resolvable:$false] %s2061_s13 }
  0x79   : > { %s2063_s17 = scalar_lea.vmem %s2062_s13, 192  ;;  %p2064_p5 = scmp.lt.s32.totalorder %s276_s19, %s2062_s13 }
  0x7a   : > { %p2059_p10 = pnand %p2057_p6, %p2013_p0  ;;  %p2065_p8 = scmp.lt.s32.totalorder %s2063_s17, %s2056_s10 }
  0x7c   : > { %p2060_p4 = pneg %p2059_p10  ;;  %p2066_p3 = por %p2065_p8, %p2064_p5 }
  0x7e   : > { %p2067_p7 = pnand %p2066_p3, %p2060_p4 }
  0x80   : > { %2070 = shalt.err (!%p2067_p7)
}
  0x81   : > { %1884 = dma.hbm_to_vmem [thread:$0]  (!%p2403_p11), %s2448_s7, 96, %s276_s19, %s264_s14  }
  0x82   : > { %p2728_p1 = scmp.ne.s32.totalorder %s2720_s29, 0 }
  0x83   : > { %s2475_s0 = sand.u32 (!%p2728_p1), 1, %s2201_s22   ;;  %p2729_p0 = scmp.ne.s32.totalorder (!%p2728_p1), %s2718_s27, 0 }
  0x84   : > { %284 = sbr.rel (%p2728_p1) target bundleno = 913 (0x391), region = 36  ;;  %s287_s20 = scalar_lea.sflag (!%p2728_p1), [#allocation4], %s2475_s0 }
  0x85   : > { %s1850_s18 = smul.u32 (!%p2728_p1), 6, %s2475_s0 }
  0x87   : > { %s290_s8 = scalar_lea.vmem (!%p2728_p1), [#allocation3], %s1850_s18 }
  0x8b   : > { %2172 = dma.done.wait (%p2729_p0), %s287_s20, 96  }
  0x8c   : > { %2174 = vsyncadd (%p2729_p0), %s287_s20, 4294967200  ;;  %s295_s15 = sand.u32 1, %s2289_s25   ;;  %s299_s7 = scalar_lea.vmem [#allocation6], %s1850_s18 }
  0x8d   : > { %s296_s29 = scalar_lea.sflag [#allocation7], %s295_s15 }
  0x8e   : > { %2176 = dma.done.wait (%p2729_p0), %s296_s29, 96  }
  0x8f   : > { %2178 = vsyncadd (%p2729_p0), %s296_s29, 4294967200  ;;  %p2730_p8 = scmp.eq.s32.totalorder %s2289_s25, 0 }
  0x91   : > { %2180 = dma.done.wait (%p2730_p8), [#allocation7], 576   ;;  %p2731_p11 = pmov %p2730_p8 }
  0x92   : > { %p2732_p9 = pmov %p2730_p8 }
  0x93   : > { %2182 = vsyncadd (%p2731_p11), [#allocation7], 4294966720 }
  0x94   : > { %2184 = dma.done.wait (%p2732_p9), [#allocation10], 48   ;;  %p2733_p12 = pmov %p2730_p8 }
  0x95   : > { %v362_v0 = vlaneseq  ;;  %vm352_vm0 = vcmask 150528   ;;  %v2217_v1 = vmov 1983009808   ;;  %v2218_v4 = vmov 0   ;;  %v356_v7 = vld [vmem:[%s290_s8] sm:$0x3f] }
  0x96   : > { %2186 = vsyncadd (%p2733_p12), [#allocation10], 4294967248  ;;  %v360_v2 = vunpack.c.l.s4 %v2217_v1  ;;  %353 = vst.msk [vmem:[#allocation2] sm:$0xf] %vm352_vm0, %v2218_v4  ;;  %vm354_vm1 = vcmask 699800   ;;  %489 = vmatprep.mubr.bf16.mxu0 %v2218_v4  ;;  %v358_v10 = vcombine.high %v356_v7, %v356_v7  ;;  %s2219_s27 = smov 19  }
  0x97   : > { %v2498_v3 = vshrl.u32 %v362_v0, 7  ;;  %355 = vst.msk [vmem:[#allocation2 + $0x8] sm:$0xf] %vm354_vm1, %v2218_v4  ;;  %v389_v8 = vld [vmem:[%s299_s7] sm:$0x3f]  ;;  %vm383_vm2 = vcmask 1041560  }
  0x98   : > { %v361_v5 = vunpack.c.0.s8 %v360_v2  ;;  %v391_v11 = vcombine.low %v389_v8, %v389_v8  ;;  %vm384_vm3 = vcmask 1045508   ;;  %vm378_vm4 = vcmask 154624   ;;  %s2222_s19 = smov 127   ;;  %s2223_s14 = smov 126   ;;  %v425_v37 = vld [vmem:[#allocation8 + $0x4] sm:$0xf] }
  0x99   : > { %vm385_vm5 = vmor %vm384_vm3, %vm383_vm2  ;;  %vm387_vm6 = vcmask 410624   ;;  %vm415_vm7 = vcmask 1043610   ;;  %vm416_vm8 = vcmask 1047558   ;;  %v2220_v24 = vmov 0.0   ;;  %s2224_s26 = smov 110   ;;  %s2225_s16 = smov 109  }
  0x9a   : > { %v364_v6 = vsub.s32 %v361_v5, %v2498_v3  ;;  %vm417_vm9 = vmor %vm416_vm8, %vm415_vm7  ;;  %1728 = vmatprep.subr.bf16.mxu1 %v2220_v24  ;;  %vm2221_vm10 = vmmov 0   ;;  %s2226_s10 = smov 108   ;;  %s2227_s9 = smov 92   ;;  %vm440_vm11 = vcmask 1039360   ;;  %vm447_vm12 = vcmask 1043456  }
  0x9b   : > { %1730 = vmatprep.mubr.msk.bf16.mxu1 %vm2221_vm10, %v2220_v24  ;;  %s2228_s13 = smov 91   ;;  %s2229_s17 = smov 90   ;;  %vm443_vm13 = vcmask 64512   ;;  %vm639_vm14 = vcmask 1031168   ;;  %v421_v44 = vld [vmem:[#allocation8] sm:$0xf] }
  0x9c   : > { %v365_v9 = vrot.slane %v356_v7, %v364_v6  ;;  %v372_v12 = vrot.slane %v358_v10, %v364_v6  ;;  %v398_v13 = vrot.slane %v391_v11, %v364_v6  ;;  %v405_v14 = vrot.slane %v389_v8, %v364_v6  ;;  %v632_v52 = vld [vmem:[#allocation8 + $0x8] sm:$0xf]  ;;  %v739_v60 = vld [vmem:[#allocation8 + $0xc] sm:$0xf]  ;;  %v846_v6 = vld [vmem:[#allocation8 + $0x10] sm:$0xf] }
  0x9d   : > { %vm746_vm15 = vcmask 900096   ;;  %vm853_vm0 = vcmask 891904   ;;  %vm960_vm1 = vcmask 883712   ;;  %vm1067_vm2 = vcmask 752640   ;;  %s1851_s18 = smul.u32 12, %s2475_s0  ;;  %p2734_p13 = scmp.ne.s32.totalorder %s2723_s11, 0 }
  0x9e   : > { %373 = vrot.lane.b32.xlu0 %v365_v9, %s2219_s27  ;;  %375 = vrot.lane.b32.xlu1 %v372_v12, %s2219_s27  ;;  %vm1174_vm3 = vcmask 744448   ;;  %s1852_s8 = smul.u32 192, %s2289_s25 }
  0x9f   : > { %s336_s20 = scalar_lea.vmem [#allocation11], %s1851_s18 }
  0xa0   : > { %s1458_s29 = sshll.u32 %s336_s20, 4  ;;  %s2592_s29 = int_to_ptr.vmem [resolvable:$true] %s1458_s29 }
  0xa2   : > { %406 = vrot.lane.b32.xlu0 %v398_v13, %s2219_s27  ;;  %408 = vrot.lane.b32.xlu1 %v405_v14, %s2219_s27  ;;  %v953_v14 = vld [vmem:[#allocation8 + $0x14] sm:$0xf] }
 0x110   : > { %v374_v15 = vpop.permute.xlu0 %373  ;;  %v376_v17 = vpop.permute.xlu1 %375 }
 0x111   : > { %v377_v16 = vrot.slane %v374_v15, 4 }
 0x113   : > { %v379_v18 = vsel %vm378_vm4, %v377_v16, %v374_v15  ;;  %v380_v19 = vsel %vm378_vm4, %v377_v16, %v376_v17 }
 0x114   : > { %386 = vst.msk [vmem:[#allocation2] sm:$0x33] %vm385_vm5, %v379_v18  ;;  %v407_v20 = vpop.permute.xlu0 %406  ;;  %v409_v22 = vpop.permute.xlu1 %408  ;;  %vm1431_vm5 = vcmask 257024  }
 0x115   : > { %388 = vst.msk [vmem:[#allocation2 + $0x8] sm:$0x3] %vm387_vm6, %v380_v19  ;;  %v410_v21 = vrot.slane %v407_v20, 4  ;;  %v1060_v22 = vld [vmem:[#allocation8 + $0x18] sm:$0xf]  ;;  %vm1401_vm6 = vcmask 261120  }
 0x117   : > { %v411_v23 = vsel %vm378_vm4, %v410_v21, %v407_v20  ;;  %vm1281_vm4 = vcmask 736256  }
 0x118   : > { %418 = vst.msk [vmem:[#allocation2] sm:$0xcc] %vm417_vm9, %v411_v23 }
 0x11c   : > { %v1954_v28 = vld [vmem:[#allocation2 + $0x8] ss:$0 sps:$4 sm:$0xff]  }
 0x11d   : > { %v548_v40 = vsel %vm447_vm12, %v1954_v28, 0 }
 0x11f   : > { %v422_v25 = vld [vmem:[#allocation2] sm:$0xff] }
 0x120   : > { %v1669_v26 = vcombine.low %v422_v25, %v422_v25  ;;  %v1670_v27 = vcombine.high %v422_v25, %v422_v25 }
 0x122   : > { %436 = vrot.lane.b32.xlu1 %v1670_v27, %s2222_s19  ;;  %434 = vrot.lane.b32.xlu0 %v1669_v26, %s2222_s19  ;;  %v542_v41 = vsel %vm447_vm12, %v1669_v26, 0 }
 0x126   : > { %633 = vrot.lane.b32.xlu1 %v1669_v26, %s2223_s14  ;;  %438 = vrot.lane.b32.xlu0 %v1954_v28, %s2222_s19  ;;  %s1456_s19 = scalar_lea.hbm %s2708_s4, %s1852_s8 }
 0x12a   : > { %637 = vrot.lane.b32.xlu1 %v1954_v28, %s2223_s14  ;;  %635 = vrot.lane.b32.xlu0 %v1670_v27, %s2223_s14  ;;  %s1434_s14 = scalar_lea.sflag [#allocation5], %s2475_s0 }
 0x12e   : > { %742 = vrot.lane.b32.xlu1 %v1670_v27, %s2224_s26  ;;  %740 = vrot.lane.b32.xlu0 %v1669_v26, %s2224_s26 }
 0x132   : > { %847 = vrot.lane.b32.xlu1 %v1669_v26, %s2225_s16  ;;  %744 = vrot.lane.b32.xlu0 %v1954_v28, %s2224_s26  ;;  %s2071_s26 = scalar_lea.vmem %s2592_s29, 192 }
 0x133   : > { %p2072_p2 = scmp.ne.s32.totalorder %s2592_s29, %s2071_s26 }
 0x135   : > { %p2073_p6 = pnand %p2072_p2, %p2734_p13 }
 0x136   : > { %851 = vrot.lane.b32.xlu1 %v1954_v28, %s2225_s16  ;;  %849 = vrot.lane.b32.xlu0 %v1670_v27, %s2225_s16  ;;  %s2230_s16 = smov [#allocation11]  }
 0x137   : > { %p2074_p10 = pneg %p2073_p6 }
 0x13a   : > { %956 = vrot.lane.b32.xlu1 %v1670_v27, %s2226_s10  ;;  %954 = vrot.lane.b32.xlu0 %v1669_v26, %s2226_s10 }
 0x13e   : > { %1061 = vrot.lane.b32.xlu1 %v1669_v26, %s2227_s9  ;;  %958 = vrot.lane.b32.xlu0 %v1954_v28, %s2226_s10  ;;  %s2075_s10 = sshll.u32 %s2230_s16, 4  ;;  %s2076_s10 = int_to_ptr.vmem [resolvable:$false] %s2075_s10 }
 0x13f   : > { %p2078_p4 = scmp.lt.s32.totalorder %s2592_s29, %s2076_s10 }
 0x142   : > { %1065 = vrot.lane.b32.xlu1 %v1954_v28, %s2227_s9  ;;  %1063 = vrot.lane.b32.xlu0 %v1670_v27, %s2227_s9  ;;  %s2077_s9 = scalar_lea.vmem %s2076_s10, 384 }
 0x143   : > { %p2079_p5 = scmp.lt.s32.totalorder %s2077_s9, %s2071_s26 }
 0x145   : > { %p2080_p3 = por %p2079_p5, %p2078_p4 }
 0x146   : > { %1170 = vrot.lane.b32.xlu1 %v1670_v27, %s2228_s13  ;;  %1168 = vrot.lane.b32.xlu0 %v1669_v26, %s2228_s13 }
 0x147   : > { %p2081_p7 = pnand %p2080_p3, %p2074_p10 }
 0x14a   : > { %1275 = vrot.lane.b32.xlu1 %v1669_v26, %s2229_s17  ;;  %1172 = vrot.lane.b32.xlu0 %v1954_v28, %s2228_s13 }
 0x14e   : > { %1279 = vrot.lane.b32.xlu1 %v1954_v28, %s2229_s17  ;;  %1277 = vrot.lane.b32.xlu0 %v1670_v27, %s2229_s17 }
 0x194   : > { %v437_v29 = vpop.permute.xlu1 %436  ;;  %v435_v30 = vpop.permute.xlu0 %434 }
 0x195   : > { %v441_v31 = vsel %vm440_vm11, %v435_v30, %v437_v29  ;;  %v1167_v30 = vld [vmem:[#allocation8 + $0x1c] sm:$0xf] }
 0x196   : > { %v449_v36 = vsel %vm447_vm12, %v441_v31, 0 }
 0x198   : > { %v634_v32 = vpop.permute.xlu1 %633  ;;  %v439_v33 = vpop.permute.xlu0 %438 }
 0x199   : > { %v442_v34 = vsel %vm440_vm11, %v437_v29, %v439_v33  ;;  %v455_v35 = vsel %vm447_vm12, %v439_v33, 0 }
 0x19a   : > { %1672 = vmatprep.subr.msk.bf16.mxu0 %vm447_vm12, %v442_v34  ;;  %1729 = vmatpush3.bf16.msra.mxu1 %v455_v35  ;;  %v1274_v34 = vld [vmem:[#allocation8 + $0x20] sm:$0xf]  ;;  %v1392_v35 = vsub.s32 2, %v2498_v3 }
 0x19b   : > { %458 = vmatpush1.bf16.msra.mxu0 %v449_v36  ;;  %1734 = vmatprep.subr.bf16.mxu1 %v2220_v24  ;;  %v1380_v36 = vld [vmem:[#allocation9] sm:$0x7] }
 0x19c   : > { %v638_v38 = vpop.permute.xlu1 %637  ;;  %1675 = vmatprep.subr.msk.bf16.mxu0 %vm447_vm12, %v1670_v27  ;;  %v636_v39 = vpop.permute.xlu0 %635 }
 0x19d   : > { %1731 = vmatmul.mubr.msk.bf16.vlgmr.msra.gmra.mrb[0].mxu1 %vm443_vm13, %v425_v37  ;;  %v641_v42 = vsel %vm639_vm14, %v636_v39, %v638_v38  ;;  %v640_v45 = vsel %vm639_vm14, %v634_v32, %v636_v39  ;;  %v652_v48 = vsel %vm447_vm12, %v638_v38, 0  ;;  %v1388_v38 = vsub.s32 1, %v2498_v3 }
 0x19e   : > { %1673 = vmatmul.mubr.msk.bf16.vlgmr.msra.gmra.mrb[0].mxu0 %vm443_vm13, %v425_v37  ;;  %1735 = vmatpush3.bf16.msra.mxu1 %v548_v40  ;;  %v646_v49 = vsel %vm447_vm12, %v640_v45, 0  ;;  %v1384_v37 = vsub.s32 0, %v2498_v3  ;;  %v1393_v39 = vrot.slane %v1380_v36, %v1392_v35 }
 0x19f   : > { %551 = vmatpush1.bf16.msra.mxu0 %v542_v41  ;;  %1736 = vmatprep.mubr.msk.bf16.mxu1 %vm2221_vm10, %v2220_v24  ;;  %v1389_v41 = vrot.slane %v1380_v36, %v1388_v38 }
 0x1a0   : > { %1678 = vmatprep.subr.msk.bf16.mxu0 %vm447_vm12, %v641_v42  ;;  %1740 = vmatprep.subr.bf16.mxu1 %v2220_v24  ;;  %v741_v43 = vpop.permute.xlu0 %740  ;;  %v743_v46 = vpop.permute.xlu1 %742  ;;  %v1385_v40 = vrot.slane %v1380_v36, %v1384_v37 }
 0x1a1   : > { %582 = vmatprep.mubr.bf16.mxu0 %v2218_v4  ;;  %v747_v53 = vsel %vm746_vm15, %v741_v43, %v743_v46 }
 0x1a2   : > { %v753_v57 = vsel %vm447_vm12, %v747_v53, 0 }
 0x1a4   : > { %v745_v47 = vpop.permute.xlu0 %744  ;;  %v848_v51 = vpop.permute.xlu1 %847 }
 0x1a5   : > { %v748_v50 = vsel %vm746_vm15, %v743_v46, %v745_v47  ;;  %v759_v56 = vsel %vm447_vm12, %v745_v47, 0 }
 0x1a8   : > { %v852_v54 = vpop.permute.xlu1 %851  ;;  %v850_v55 = vpop.permute.xlu0 %849 }
 0x1a9   : > { %1737 = vmatmul.mubr.msk.bf16.vlgmr.msra.gmra.mrb[0].mxu1 %vm443_vm13, %v421_v44  ;;  %v855_v58 = vsel %vm853_vm0, %v850_v55, %v852_v54  ;;  %v854_v61 = vsel %vm853_vm0, %v848_v51, %v850_v55  ;;  %v866_v0 = vsel %vm447_vm12, %v852_v54, 0 }
 0x1aa   : > { %1741 = vmatpush3.bf16.msra.mxu1 %v652_v48  ;;  %1676 = vmatmul.mubr.msk.bf16.vlgmr.msra.gmra.mrb[0].mxu0 %vm443_vm13, %v421_v44  ;;  %v860_v1 = vsel %vm447_vm12, %v854_v61, 0 }
 0x1ab   : > { %655 = vmatpush1.bf16.msra.mxu0 %v646_v49  ;;  %1742 = vmatprep.mubr.msk.bf16.mxu1 %vm2221_vm10, %v2220_v24 }
 0x1ac   : > { %1681 = vmatprep.subr.msk.bf16.mxu0 %vm447_vm12, %v748_v50  ;;  %1746 = vmatprep.subr.bf16.mxu1 %v2220_v24  ;;  %v955_v59 = vpop.permute.xlu0 %954  ;;  %v957_v62 = vpop.permute.xlu1 %956 }
 0x1ad   : > { %686 = vmatprep.mubr.bf16.mxu0 %v2218_v4  ;;  %v961_v7 = vsel %vm960_vm1, %v955_v59, %v957_v62 }
 0x1ae   : > { %v967_v11 = vsel %vm447_vm12, %v961_v7, 0 }
 0x1b0   : > { %v959_v63 = vpop.permute.xlu0 %958  ;;  %v1062_v5 = vpop.permute.xlu1 %1061 }
 0x1b1   : > { %v962_v2 = vsel %vm960_vm1, %v957_v62, %v959_v63  ;;  %v973_v10 = vsel %vm447_vm12, %v959_v63, 0 }
 0x1b4   : > { %v1066_v8 = vpop.permute.xlu1 %1065  ;;  %v1064_v9 = vpop.permute.xlu0 %1063 }
 0x1b5   : > { %1743 = vmatmul.mubr.msk.bf16.vlgmr.msra.gmra.mrb[0].mxu1 %vm443_vm13, %v632_v52  ;;  %v1069_v12 = vsel %vm1067_vm2, %v1064_v9, %v1066_v8  ;;  %v1068_v15 = vsel %vm1067_vm2, %v1062_v5, %v1064_v9  ;;  %v1080_v18 = vsel %vm447_vm12, %v1066_v8, 0 }
 0x1b6   : > { %1747 = vmatpush3.bf16.msra.mxu1 %v759_v56  ;;  %1679 = vmatmul.mubr.msk.bf16.vlgmr.msra.gmra.mrb[0].mxu0 %vm443_vm13, %v632_v52  ;;  %v1074_v19 = vsel %vm447_vm12, %v1068_v15, 0 }
 0x1b7   : > { %762 = vmatpush1.bf16.msra.mxu0 %v753_v57  ;;  %1748 = vmatprep.mubr.msk.bf16.mxu1 %vm2221_vm10, %v2220_v24 }
 0x1b8   : > { %1684 = vmatprep.subr.msk.bf16.mxu0 %vm447_vm12, %v855_v58  ;;  %1752 = vmatprep.subr.bf16.mxu1 %v2220_v24  ;;  %v1169_v13 = vpop.permute.xlu0 %1168  ;;  %v1171_v16 = vpop.permute.xlu1 %1170 }
 0x1b9   : > { %793 = vmatprep.mubr.bf16.mxu0 %v2218_v4  ;;  %v1175_v23 = vsel %vm1174_vm3, %v1169_v13, %v1171_v16 }
 0x1ba   : > { %v1181_v28 = vsel %vm447_vm12, %v1175_v23, 0 }
 0x1bc   : > { %v1173_v17 = vpop.permute.xlu0 %1172  ;;  %v1276_v21 = vpop.permute.xlu1 %1275 }
 0x1bd   : > { %v1176_v20 = vsel %vm1174_vm3, %v1171_v16, %v1173_v17  ;;  %v1187_v27 = vsel %vm447_vm12, %v1173_v17, 0 }
 0x1c0   : > { %v1280_v25 = vpop.permute.xlu1 %1279  ;;  %v1278_v26 = vpop.permute.xlu0 %1277 }
 0x1c1   : > { %1749 = vmatmul.mubr.msk.bf16.vlgmr.msra.gmra.mrb[0].mxu1 %vm443_vm13, %v739_v60  ;;  %v1283_v29 = vsel %vm1281_vm4, %v1278_v26, %v1280_v25  ;;  %v1282_v31 = vsel %vm1281_vm4, %v1276_v21, %v1278_v26  ;;  %v1294_v32 = vsel %vm447_vm12, %v1280_v25, 0 }
 0x1c2   : > { %1753 = vmatpush3.bf16.msra.mxu1 %v866_v0  ;;  %1682 = vmatmul.mubr.msk.bf16.vlgmr.msra.gmra.mrb[0].mxu0 %vm443_vm13, %v739_v60  ;;  %v1288_v33 = vsel %vm447_vm12, %v1282_v31, 0 }
 0x1c3   : > { %869 = vmatpush1.bf16.msra.mxu0 %v860_v1  ;;  %1754 = vmatprep.mubr.msk.bf16.mxu1 %vm2221_vm10, %v2220_v24 }
 0x1c4   : > { %1687 = vmatprep.subr.msk.bf16.mxu0 %vm447_vm12, %v962_v2  ;;  %1758 = vmatprep.subr.bf16.mxu1 %v2220_v24 }
 0x1c5   : > { %900 = vmatprep.mubr.bf16.mxu0 %v2218_v4 }
 0x1cd   : > { %1755 = vmatmul.mubr.msk.bf16.vlgmr.msra.gmra.mrb[0].mxu1 %vm443_vm13, %v846_v6 }
 0x1ce   : > { %1759 = vmatpush3.bf16.msra.mxu1 %v973_v10  ;;  %1685 = vmatmul.mubr.msk.bf16.vlgmr.msra.gmra.mrb[0].mxu0 %vm443_vm13, %v846_v6 }
 0x1cf   : > { %976 = vmatpush1.bf16.msra.mxu0 %v967_v11  ;;  %1760 = vmatprep.mubr.msk.bf16.mxu1 %vm2221_vm10, %v2220_v24 }
 0x1d0   : > { %1690 = vmatprep.subr.msk.bf16.mxu0 %vm447_vm12, %v1069_v12  ;;  %1764 = vmatprep.subr.bf16.mxu1 %v2220_v24 }
 0x1d1   : > { %1007 = vmatprep.mubr.bf16.mxu0 %v2218_v4 }
 0x1d9   : > { %1761 = vmatmul.mubr.msk.bf16.vlgmr.msra.gmra.mrb[0].mxu1 %vm443_vm13, %v953_v14 }
 0x1da   : > { %1765 = vmatpush3.bf16.msra.mxu1 %v1080_v18  ;;  %1688 = vmatmul.mubr.msk.bf16.vlgmr.msra.gmra.mrb[0].mxu0 %vm443_vm13, %v953_v14 }
 0x1db   : > { %1083 = vmatpush1.bf16.msra.mxu0 %v1074_v19  ;;  %1766 = vmatprep.mubr.msk.bf16.mxu1 %vm2221_vm10, %v2220_v24 }
 0x1dc   : > { %1693 = vmatprep.subr.msk.bf16.mxu0 %vm447_vm12, %v1176_v20  ;;  %1770 = vmatprep.subr.bf16.mxu1 %v2220_v24 }
 0x1dd   : > { %1114 = vmatprep.mubr.bf16.mxu0 %v2218_v4 }
 0x1e5   : > { %1767 = vmatmul.mubr.msk.bf16.vlgmr.msra.gmra.mrb[0].mxu1 %vm443_vm13, %v1060_v22 }
 0x1e6   : > { %1771 = vmatpush3.bf16.msra.mxu1 %v1187_v27  ;;  %1691 = vmatmul.mubr.msk.bf16.vlgmr.msra.gmra.mrb[0].mxu0 %vm443_vm13, %v1060_v22 }
 0x1e7   : > { %1190 = vmatpush1.bf16.msra.mxu0 %v1181_v28  ;;  %1772 = vmatprep.mubr.msk.bf16.mxu1 %vm2221_vm10, %v2220_v24 }
 0x1e8   : > { %1696 = vmatprep.subr.msk.bf16.mxu0 %vm447_vm12, %v1283_v29  ;;  %1776 = vmatprep.subr.bf16.mxu1 %v2220_v24 }
 0x1e9   : > { %1221 = vmatprep.mubr.bf16.mxu0 %v2218_v4 }
 0x1f1   : > { %1773 = vmatmul.mubr.msk.bf16.vlgmr.msra.gmra.mrb[0].mxu1 %vm443_vm13, %v1167_v30 }
 0x1f2   : > { %1777 = vmatpush3.bf16.msra.mxu1 %v1294_v32  ;;  %1694 = vmatmul.mubr.msk.bf16.vlgmr.msra.gmra.mrb[0].mxu0 %vm443_vm13, %v1167_v30 }
 0x1f3   : > { %1297 = vmatpush1.bf16.msra.mxu0 %v1288_v33  ;;  %1778 = vmatprep.mubr.msk.bf16.mxu1 %vm2221_vm10, %v2220_v24 }
 0x1f4   : > { %1328 = vmatprep.mubr.bf16.mxu0 %v2218_v4 }
 0x1fd   : > { %1779 = vmatmul.mubr.msk.bf16.vlgmr.msra.gmra.mrb[0].mxu1 %vm443_vm13, %v1274_v34 }
 0x1fe   : > { %1697 = vmatmul.mubr.msk.bf16.vlgmr.msra.gmra.mrb[0].mxu0 %vm443_vm13, %v1274_v34 }
 0x2d0   : > { %v1371_v42 = vpop.f32.mrb[0].mxu1 }
 0x2d1   : > { %v1399_v24 = vmul.f32 %v1393_v39, %v1371_v42  ;;  %v1709_v4 = vpack.c.bf16 %v1371_v42, %v1371_v42  ;;  %v1330_v43 = vpop.f32.mrb[0].mxu0  ;;  %v1780_v44 = vpop.f32.mrb[1].mxu1 }
 0x2d2   : > { %v1397_v45 = vmul.f32 %v1385_v40, %v1330_v43  ;;  %v1332_v46 = vpop.f32.mrb[1].mxu0  ;;  %v1374_v47 = vpop.f32.mrb[2].mxu1 }
 0x2d3   : > { %v1398_v48 = vmul.f32 %v1389_v41, %v1332_v46  ;;  %v1708_v49 = vpack.c.bf16 %v1332_v46, %v1330_v43  ;;  %v1334_v50 = vpop.f32.mrb[2].mxu0  ;;  %v1781_v51 = vpop.f32.mrb[3].mxu1  ;;  %1432 = vst.msk [vmem:[%s336_s20 + $0x8] sm:$0xf] %vm1431_vm5, %v1709_v4  ;;  %v1410_v3 = vmul.f32 %v1399_v24, %v1371_v42  ;;  %v1402_v56 = vsel %vm1401_vm6, %v1399_v24, 0.0 }
 0x2d4   : > { %v1408_v52 = vmul.f32 %v1397_v45, %v1330_v43  ;;  %v1335_v53 = vpop.f32.mrb[3].mxu0 }
 0x2d5   : > { %v1409_v54 = vmul.f32 %v1398_v48, %v1332_v46  ;;  %1430 = vst [vmem:[%s336_s20] sm:$0xff] %v1708_v49  ;;  %v1400_v55 = vadd.f32 %v1398_v48, %v1397_v45  ;;  %v1412_v59 = vsel %vm1401_vm6, %v1410_v3, 0.0 }
 0x2d7   : > { %v1403_v57 = vadd.f32 %v1402_v56, %v1400_v55  ;;  %v1411_v58 = vadd.f32 %v1409_v54, %v1408_v52 }
 0x2d9   : > { %1404 = vadd.xlane.f32.xlu0 %v1403_v57  ;;  %v1413_v60 = vadd.f32 %v1412_v59, %v1411_v58 }
 0x2db   : > { %1414 = vadd.xlane.f32.xlu1 %v1413_v60 }
 0x2dc   : > { %2084 = shalt.err (!%p2081_p7)
}
 0x2dd   : > { %s2085_s13 = scalar_lea.hbm %s1456_s19, 192  ;;  %s2089_s20 = scalar_lea.hbm %s2708_s4, 384 }
 0x2de   : > { %p2086_p1 = scmp.ne.s32.totalorder %s1456_s19, %s2085_s13  ;;  %p2090_p11 = scmp.lt.u32.totalorder %s1456_s19, %s2708_s4 }
 0x2df   : > { %p2091_p9 = scmp.lt.u32.totalorder %s2089_s20, %s2085_s13  ;;  %p2093_p2 = scmp.lt.u32.totalorder %s2085_s13, %s1456_s19 }
 0x2e0   : > { %p2087_p0 = pnand %p2086_p1, %p2734_p13 }
 0x2e1   : > { %p2092_p12 = por %p2091_p9, %p2090_p11 }
 0x2e2   : > { %p2088_p8 = pneg %p2087_p0 }
 0x2e3   : > { %p2094_p6 = por %p2093_p2, %p2092_p12 }
 0x2e5   : > { %p2095_p10 = pnand %p2094_p6, %p2088_p8 }
 0x2e7   : > { %2098 = shalt.err (!%p2095_p10)
}
 0x2e8   : > { %1865 = dma.vmem_to_hbm [thread:$0]  (%p2734_p13), %s2592_s29, 192, %s1456_s19, %s1434_s14   ;;  %vm1406_vm7 = vcmask 7168  }
 0x2e9   : > { %s1667_s27 = sshll.u32 %s2475_s0, 3  ;;  %s1704_s26 = sshll.u32 %s2289_s25, 7 }
 0x2ea   : > { %s343_s16 = scalar_lea.vmem [#allocation12], %s1667_s27  ;;  %s2616_s9 = scalar_lea.vmem [#allocation14], %s1667_s27 }
 0x2eb   : > { %s1471_s10 = sshll.u32 %s343_s16, 4  ;;  %s1484_s13 = sshll.u32 %s2616_s9, 4  ;;  %s2624_s10 = int_to_ptr.vmem [resolvable:$true] %s1471_s10  ;;  %s2632_s13 = int_to_ptr.vmem [resolvable:$true] %s1484_s13 }
 0x2ec   : > { %s2622_s20 = scalar_lea.hbm %s2709_s5, %s1704_s26  ;;  %s2630_s19 = scalar_lea.hbm %s2710_s6, %s1704_s26 }
 0x2ed   : > { %s2636_s14 = scalar_lea.sflag [#allocation13], %s295_s15  ;;  %s2099_s8 = scalar_lea.vmem %s2624_s10, 128 }
 0x2ee   : > { %p2100_p4 = scmp.ne.s32.totalorder %s2624_s10, %s2099_s8  ;;  %s2231_s7 = smov [#allocation12]  }
 0x2ef   : > { %s2103_s27 = sshll.u32 %s2231_s7, 4  ;;  %s2104_s27 = int_to_ptr.vmem [resolvable:$false] %s2103_s27 }
 0x2f0   : > { %p2101_p5 = pnand %p2100_p4, %p2734_p13  ;;  %p2106_p7 = scmp.lt.s32.totalorder %s2624_s10, %s2104_s27 }
 0x2f2   : > { %p2102_p3 = pneg %p2101_p5 }
 0x366   : > { %v1405_v61 = vpop.xlane.xlu0 %1404 }
 0x367   : > { %1407 = vst.msk [vmem:[%s343_s16] sm:$0xff] %vm1406_vm7, %v1405_v61  ;;  %s2105_s16 = scalar_lea.vmem %s2104_s27, 256 }
 0x368   : > { %v1415_v62 = vpop.xlane.xlu1 %1414  ;;  %p2107_p1 = scmp.lt.s32.totalorder %s2105_s16, %s2099_s8 }
 0x36a   : > { %p2108_p0 = por %p2107_p1, %p2106_p7 }
 0x36c   : > { %p2109_p8 = pnand %p2108_p0, %p2102_p3 }
 0x36e   : > { %2112 = shalt.err (!%p2109_p8)
}
 0x36f   : > { %s2113_s25 = scalar_lea.hbm %s2622_s20, 128  ;;  %s2117_s17 = scalar_lea.hbm %s2709_s5, 256 }
 0x370   : > { %p2114_p11 = scmp.ne.s32.totalorder %s2622_s20, %s2113_s25  ;;  %p2118_p2 = scmp.lt.u32.totalorder %s2622_s20, %s2709_s5 }
 0x371   : > { %p2119_p6 = scmp.lt.u32.totalorder %s2117_s17, %s2113_s25  ;;  %p2121_p4 = scmp.lt.u32.totalorder %s2113_s25, %s2622_s20 }
 0x372   : > { %p2115_p9 = pnand %p2114_p11, %p2734_p13 }
 0x373   : > { %p2120_p10 = por %p2119_p6, %p2118_p2 }
 0x374   : > { %p2116_p12 = pneg %p2115_p9 }
 0x375   : > { %p2122_p5 = por %p2121_p4, %p2120_p10 }
 0x377   : > { %p2123_p3 = pnand %p2122_p5, %p2116_p12 }
 0x379   : > { %2126 = shalt.err (!%p2123_p3)
}
 0x37a   : > { %1866 = dma.vmem_to_hbm [thread:$0]  (%p2734_p13), %s2624_s10, 128, %s2622_s20, %s2636_s14   ;;  %1416 = vst.msk [vmem:[%s2616_s9] sm:$0xff] %vm1406_vm7, %v1415_v62 }
 0x37b   : > { %s2127_s29 = scalar_lea.vmem %s2632_s13, 128  ;;  %s2232_s8 = smov [#allocation14]  }
 0x37c   : > { %p2128_p7 = scmp.ne.s32.totalorder %s2632_s13, %s2127_s29  ;;  %s2131_s7 = sshll.u32 %s2232_s8, 4  ;;  %s2132_s7 = int_to_ptr.vmem [resolvable:$false] %s2131_s7 }
 0x37d   : > { %s2133_s27 = scalar_lea.vmem %s2132_s7, 256  ;;  %p2134_p8 = scmp.lt.s32.totalorder %s2632_s13, %s2132_s7 }
 0x37e   : > { %p2129_p1 = pnand %p2128_p7, %p2734_p13  ;;  %p2135_p11 = scmp.lt.s32.totalorder %s2133_s27, %s2127_s29 }
 0x380   : > { %p2130_p0 = pneg %p2129_p1  ;;  %p2136_p9 = por %p2135_p11, %p2134_p8 }
 0x382   : > { %p2137_p12 = pnand %p2136_p9, %p2130_p0 }
 0x384   : > { %2140 = shalt.err (!%p2137_p12)
}
 0x385   : > { %s2141_s10 = scalar_lea.hbm %s2630_s19, 128  ;;  %s2145_s16 = scalar_lea.hbm %s2710_s6, 256 }
 0x386   : > { %p2142_p2 = scmp.ne.s32.totalorder %s2630_s19, %s2141_s10  ;;  %p2146_p4 = scmp.lt.u32.totalorder %s2630_s19, %s2710_s6 }
 0x387   : > { %p2147_p5 = scmp.lt.u32.totalorder %s2145_s16, %s2141_s10  ;;  %p2149_p7 = scmp.lt.u32.totalorder %s2141_s10, %s2630_s19 }
 0x388   : > { %p2143_p6 = pnand %p2142_p2, %p2734_p13 }
 0x389   : > { %p2148_p3 = por %p2147_p5, %p2146_p4 }
 0x38a   : > { %p2144_p10 = pneg %p2143_p6 }
 0x38b   : > { %p2150_p1 = por %p2149_p7, %p2148_p3 }
 0x38d   : > { %p2151_p0 = pnand %p2150_p1, %p2144_p10 }
 0x38f   : > { %2154 = shalt.err (!%p2151_p0)
}
 0x390   : > { %1867 = dma.vmem_to_hbm [thread:$0]  (%p2734_p13), %s2632_s13, 128, %s2630_s19, %s2636_s14  }
 0x391 PF: > { %s1496_s26 = sand.u32 1, %s2197_s21   ;;  %p2735_p8 = scmp.ne.s32.totalorder %s2719_s28, 0 }
 0x392   : > { %p2736_p11 = scmp.ge.s32.totalorder %s2209_s24, 2  ;;  %s1497_s17 = scalar_lea.sflag [#allocation5], %s1496_s26 }
 0x394   : > { %p1886_p9 = pnand %p2736_p11, %p2735_p8 }
 0x396   : > { %2188 = dma.done.wait (!%p1886_p9), %s1497_s17, 192  }
 0x397   : > { %2190 = vsyncadd (!%p1886_p9), %s1497_s17, 4294967104  ;;  %s2737_s18 = sadd.s32 4294967294, %s2209_s24  }
 0x398   : > { %s1505_s0 = sand.u32 1, %s2737_s18  }
 0x399   : > { %s1506_s29 = scalar_lea.sflag [#allocation13], %s1505_s0 }
 0x39a   : > { %2192 = dma.done.wait (!%p1886_p9), %s1506_s29, 256  }
 0x39b   : > { %2194 = vsyncadd (!%p1886_p9), %s1506_s29, 4294967040  ;;  %p27_p13 = scmp.ge.s32.totalorder %s2381_s30, 4   ;;  %s2738_s21 = smov %s2201_s22 }
 0x39c   : > { %s2739_s22 = smov %s2205_s23  ;;  %s2740_s23 = smov %s2397_s12 }
 0x39d   : > { %s2741_s24 = smov %s2381_s30  ;;  %29 = sbr.rel (!%p27_p13) target bundleno = 12 (0xc), region = 142 }
 0x3a4   :  { %1520 = vsyncpa [#allocation4], 1 }
 0x3a5   :  { %1522 = vsyncpa [#allocation4 + $0x1], 1 }
 0x3a6   :  { %1523 = vsyncpa [#allocation7], 1 }
 0x3a7   :  { %1525 = vsyncpa [#allocation7 + $0x1], 1 }
 0x3a8   :  { %1526 = vsyncpa [#allocation10], 1 }
 0x3a9   :  { %1527 = vsyncpa [#allocation5], 1 }
 0x3aa   :  { %1529 = vsyncpa [#allocation5 + $0x1], 1 }
 0x3ab   :  { %1530 = vsyncpa [#allocation13], 1 }
 0x3ac   :  { %1532 = vsyncpa [#allocation13 + $0x1], 1 }

// kernel: up_forward.4
= control target key start
LH: loop header
LB: loop body
LE: loop exit
PB: predicated region body
PF: predicated region fallthrough
CT: control target
= control target key end

     0   :  { %s2730_s0 = inlined_call_operand.hbm [shape: bf16[2,8,288], index: 0, kind: input, shape index: {}]   ;;  %s2731_s1 = inlined_call_operand.hbm [shape: f32[8,1], index: 1, kind: input, shape index: {}]   ;;  %s2732_s2 = inlined_call_operand.hbm [shape: f32[8,1], index: 2, kind: input, shape index: {}]   ;;  %s2733_s3 = inlined_call_operand.hbm [shape: bf16[9,8,8], index: 3, kind: input, shape index: {}]   ;;  %s2734_s4 = inlined_call_operand.hbm [shape: f32[1,288], index: 4, kind: input, shape index: {}]   ;;  %s2735_s5 = inlined_call_operand.hbm [shape: f32[2,8,288], index: 5, kind: output, shape index: {0}]   ;;  %s2736_s6 = inlined_call_operand.hbm [shape: f32[2,8,1], index: 6, kind: output, shape index: {1}]   ;;  %s2737_s7 = inlined_call_operand.hbm [shape: f32[2,8,1], index: 7, kind: output, shape index: {2}]  }
   0x1   :  { %2742 = sst [smem:[#allocation21_spill]] %s2731_s1 }
   0x2   :  { %13 = vsyncpa [#allocation4], 0 }
   0x3   :  { %15 = vsyncpa [#allocation4 + $0x1], 0 }
   0x4   :  { %16 = vsyncpa [#allocation7], 0 }
   0x5   :  { %17 = vsyncpa [#allocation10], 0 }
   0x6   :  { %18 = vsyncpa [#allocation5], 0 }
   0x7   :  { %20 = vsyncpa [#allocation5 + $0x1], 0 }
   0x8   :  { %21 = vsyncpa [#allocation14], 0 }
   0x9   :  { %23 = vsyncpa [#allocation14 + $0x1], 0  ;;  %s2297_s24 = smov 0   ;;  %s2299_s25 = smov 0  }
   0xa   :  { %s2301_s26 = smov 0   ;;  %s2303_s27 = smov 0  }
   0xb LB: > { %s2235_s28 = smov [#allocation6]   ;;  %s2318_s30 = sadd.s32 4294967295, %s2233_s27   ;;  %s2233_s27 = sphi %s2303_s27, %s2764_s27   ;;  %s2229_s26 = sphi %s2301_s26, %s2763_s26   ;;  %s2225_s25 = sphi %s2299_s25, %s2762_s25   ;;  %s2221_s24 = sphi %s2297_s24, %s2761_s24  }
   0xc   : > { %s235_s29 = sshll.u32 %s2235_s28, 4  ;;  %p1646_p0 = scmp.ge.s32.totalorder %s2233_s27, 1  ;;  %s236_s29 = int_to_ptr.vmem [resolvable:$true] %s235_s29 }
   0xd   : > { %p2738_p1 = scmp.eq.s32.totalorder %s2318_s30, 0  ;;  %p222_p2 = scmp.lt.s32.totalorder %s2233_s27, 3 }
   0xe   : > { %s2236_s9 = smov [#allocation9]   ;;  %s2237_s12 = smov [#allocation8]  }
   0xf   : > { %p2323_p3 = pnand %p1646_p0, %p222_p2  ;;  %s256_s10 = sshll.u32 %s2236_s9, 4  ;;  %s2330_s10 = int_to_ptr.vmem [resolvable:$true] %s256_s10 }
  0x10   : > { %s246_s13 = sshll.u32 %s2237_s12, 4  ;;  %s2745_s1 = sld [smem:[#allocation21_spill]]  ;;  %s2338_s13 = int_to_ptr.vmem [resolvable:$true] %s246_s13 }
  0x11   : > { %s2743_s8 = scalar_select %p2323_p3, 1, 0 }
  0x12   : > { %p1866_p5 = pneg %p2323_p3 }
  0x14   : > { %p2334_p6 = pnand %p1866_p5, %p2738_p1 }
  0x16   : > { %s1957_s16 = scalar_lea.hbm %s2745_s1, 128  ;;  %p2348_p8 = pneg %p2334_p6 }
  0x17   : > { %p1958_p7 = scmp.ne.s32.totalorder %s2745_s1, %s1957_s16  ;;  %p1964_p11 = scmp.lt.u32.totalorder %s1957_s16, %s2745_s1 }
  0x19   : > { %p1960_p9 = pnand %p2348_p8, %p1958_p7 }
  0x1b   : > { %p1961_p10 = pneg %p1960_p9 }
  0x1d   : > { %p1966_p12 = pnand %p1964_p11, %p1961_p10 }
  0x1f   : > { %1969 = shalt.err (!%p1966_p12)
}
  0x20   : > { %s1970_s22 = scalar_lea.vmem %s236_s29, 128  ;;  %p1978_p5 = scmp.lt.s32.totalorder %s236_s29, %s236_s29 }
  0x21   : > { %p1971_p13 = scmp.ne.s32.totalorder %s236_s29, %s1970_s22  ;;  %p1979_p4 = scmp.lt.s32.totalorder %s1970_s22, %s1970_s22 }
  0x23   : > { %p1973_p0 = pnand %p1971_p13, %p2348_p8  ;;  %p1980_p1 = por %p1979_p4, %p1978_p5 }
  0x25   : > { %p1974_p2 = pneg %p1973_p0 }
  0x27   : > { %p1981_p3 = pnand %p1980_p1, %p1974_p2 }
  0x29   : > { %1984 = shalt.err (!%p1981_p3)
}
  0x2a   : > { %1869 = dma.hbm_to_vmem [thread:$0]  (!%p2334_p6), %s2745_s1, 128, %s236_s29, [#allocation7]  }
  0x2b   : > { %s1985_s14 = scalar_lea.hbm %s2733_s3, 576 }
  0x2c   : > { %p1986_p7 = scmp.ne.s32.totalorder %s2733_s3, %s1985_s14  ;;  %p1992_p1 = scmp.lt.u32.totalorder %s1985_s14, %s2733_s3 }
  0x2e   : > { %p1988_p9 = pnand %p1986_p7, %p2348_p8 }
  0x30   : > { %p1989_p4 = pneg %p1988_p9 }
  0x32   : > { %p1994_p3 = pnand %p1992_p1, %p1989_p4 }
  0x34   : > { %1997 = shalt.err (!%p1994_p3)
}
  0x35   : > { %s1998_s29 = scalar_lea.vmem %s2330_s10, 576  ;;  %p2006_p13 = scmp.lt.s32.totalorder %s2330_s10, %s2330_s10 }
  0x36   : > { %p1999_p10 = scmp.ne.s32.totalorder %s2330_s10, %s1998_s29  ;;  %p2007_p0 = scmp.lt.s32.totalorder %s1998_s29, %s1998_s29 }
  0x38   : > { %p2001_p11 = pnand %p1999_p10, %p2348_p8  ;;  %p2008_p2 = por %p2007_p0, %p2006_p13 }
  0x3a   : > { %p2002_p12 = pneg %p2001_p11 }
  0x3c   : > { %p2009_p5 = pnand %p2008_p2, %p2002_p12 }
  0x3e   : > { %2012 = shalt.err (!%p2009_p5)
}
  0x3f   : > { %s2238_s20 = smov 64   ;;  %s2239_s21 = smov 4  }
  0x40   : > { %1875 = dma.hbm_to_vmem [thread:$0]  (!%p2334_p6), %s2733_s3, 576, %s2330_s10, [#allocation10], %s2238_s20, %s2238_s20, %s2239_s21  }
  0x41   : > { %s2013_s12 = scalar_lea.hbm %s2732_s2, 128 }
  0x42   : > { %p2014_p7 = scmp.ne.s32.totalorder %s2732_s2, %s2013_s12  ;;  %p2020_p1 = scmp.lt.u32.totalorder %s2013_s12, %s2732_s2 }
  0x44   : > { %p2016_p9 = pnand %p2014_p7, %p2348_p8 }
  0x46   : > { %p2017_p4 = pneg %p2016_p9 }
  0x48   : > { %p2022_p3 = pnand %p2020_p1, %p2017_p4 }
  0x4a   : > { %2025 = shalt.err (!%p2022_p3)
}
  0x4b   : > { %s2026_s10 = scalar_lea.vmem %s2338_s13, 128  ;;  %p2034_p13 = scmp.lt.s32.totalorder %s2338_s13, %s2338_s13 }
  0x4c   : > { %p2027_p10 = scmp.ne.s32.totalorder %s2338_s13, %s2026_s10  ;;  %p2035_p0 = scmp.lt.s32.totalorder %s2026_s10, %s2026_s10 }
  0x4e   : > { %p2029_p11 = pnand %p2027_p10, %p2348_p8  ;;  %p2036_p2 = por %p2035_p0, %p2034_p13 }
  0x50   : > { %p2030_p12 = pneg %p2029_p11 }
  0x52   : > { %p2037_p5 = pnand %p2036_p2, %p2030_p12 }
  0x54   : > { %2040 = shalt.err (!%p2037_p5)
}
  0x55   : > { %1872 = dma.hbm_to_vmem [thread:$0]  (!%p2334_p6), %s2732_s2, 128, %s2338_s13, [#allocation7]  }
  0x56   : > { %s2240_s20 = smov [#allocation11]   ;;  %s2041_s28 = scalar_lea.hbm %s2734_s4, 48 }
  0x57   : > { %s270_s21 = sshll.u32 %s2240_s20, 4  ;;  %p2042_p7 = scmp.ne.s32.totalorder %s2734_s4, %s2041_s28  ;;  %s271_s21 = int_to_ptr.vmem [resolvable:$true] %s270_s21 }
  0x58   : > { %p2048_p1 = scmp.lt.u32.totalorder %s2041_s28, %s2734_s4 }
  0x59   : > { %p2044_p9 = pnand %p2042_p7, %p2348_p8 }
  0x5b   : > { %p2045_p4 = pneg %p2044_p9 }
  0x5d   : > { %p2050_p3 = pnand %p2048_p1, %p2045_p4 }
  0x5f   : > { %2053 = shalt.err (!%p2050_p3)
}
  0x60   : > { %s2054_s13 = scalar_lea.vmem %s271_s21, 48  ;;  %s2061_s16 = scalar_lea.vmem %s271_s21, 64 }
  0x61   : > { %p2055_p10 = scmp.ne.s32.totalorder %s271_s21, %s2054_s13  ;;  %p2062_p13 = scmp.lt.s32.totalorder %s271_s21, %s271_s21 }
  0x62   : > { %p2063_p0 = scmp.lt.s32.totalorder %s2061_s16, %s2054_s13 }
  0x63   : > { %p2057_p11 = pnand %p2055_p10, %p2348_p8 }
  0x64   : > { %p2064_p2 = por %p2063_p0, %p2062_p13 }
  0x65   : > { %p2058_p12 = pneg %p2057_p11 }
  0x67   : > { %p2065_p5 = pnand %p2064_p2, %p2058_p12 }
  0x69   : > { %2068 = shalt.err (!%p2065_p5)
}
  0x6a   : > { %1878 = dma.hbm_to_vmem [thread:$0]  (!%p2334_p6), %s2734_s4, 48, %s271_s21, [#allocation10]  }
  0x6b   : > { %s2740_s11 = sadd.s32 4294967294, %s2233_s27   ;;  %s2430_s19 = sadd.s32 1, %s2233_s27  }
  0x6c   : > { %s33_s18 = ssub.s32 %s2233_s27, %s2430_s19  ;;  %s36_s29 = sadd.s32 1, %s2229_s26 }
  0x6d   : > { %p34_p8 = scmp.eq.s32.totalorder %s33_s18, 0  ;;  %p43_p7 = scmp.ne.s32.totalorder %s2229_s26, %s2225_s25 }
  0x6e   : > { %p44_p9 = scmp.eq.s32.totalorder %s2233_s27, 0  ;;  %p49_p4 = scmp.ne.s32.totalorder %s2225_s25, %s2221_s24 }
  0x6f   : > { %s2441_s20 = scalar_select %p34_p8, %s2229_s26, %s36_s29  }
  0x70   : > { %p45_p1 = por %p44_p9, %p43_p7  ;;  %p2747_p3 = scmp.eq.s32.totalorder %s2318_s30, 0 }
  0x71   : > { %p157_p6 = scmp.eq.s32.totalorder %s2318_s30, 1  ;;  %p163_p11 = scmp.eq.s32.totalorder %s2740_s11, 1 }
  0x72   : > { %p2445_p10 = por %p2747_p3, %p49_p4  ;;  %p1897_p12 = scmp.lt.s32.totalorder %s2233_s27, 2 }
  0x73   : > { %s281_s21 = sand.u32 1, %s2229_s26   ;;  %p2454_p13 = por %p157_p6, %p43_p7 }
  0x74   : > { %p2458_p0 = por %p163_p11, %p49_p4  ;;  %s1837_s9 = smul.u32 12, %s281_s21 }
  0x75   : > { %s2749_s23 = scalar_select %p2454_p13, 1, 0 }
  0x76   : > { %s2750_s28 = scalar_select %p2458_p0, 1, 0 }
  0x77   : > { %s1838_s12 = smul.u32 192, %s2233_s27  ;;  %p2463_p2 = pnand %p1897_p12, %p45_p1 }
  0x78   : > { %s285_s17 = scalar_lea.vmem [#allocation3], %s1837_s9  ;;  %s282_s18 = scalar_lea.sflag [#allocation4], %s281_s21 }
  0x79   : > { %s2470_s16 = scalar_lea.hbm %s2730_s0, %s1838_s12  ;;  %s293_s10 = sshll.u32 %s285_s17, 4  ;;  %s2472_s10 = int_to_ptr.vmem [resolvable:$true] %s293_s10 }
  0x7a   : > { %s2069_s29 = scalar_lea.hbm %s2470_s16, 192  ;;  %p2071_p8 = pneg %p2463_p2 }
  0x7b   : > { %p2070_p5 = scmp.ne.s32.totalorder %s2470_s16, %s2069_s29  ;;  %s2074_s13 = scalar_lea.hbm %s2730_s0, 384 }
  0x7c   : > { %p2075_p4 = scmp.lt.u32.totalorder %s2470_s16, %s2730_s0  ;;  %p2076_p1 = scmp.lt.u32.totalorder %s2074_s13, %s2069_s29 }
  0x7d   : > { %p2072_p7 = pnand %p2071_p8, %p2070_p5  ;;  %p2078_p6 = scmp.lt.u32.totalorder %s2069_s29, %s2470_s16 }
  0x7e   : > { %p2077_p3 = por %p2076_p1, %p2075_p4 }
  0x7f   : > { %p2073_p9 = pneg %p2072_p7 }
  0x80   : > { %p2079_p11 = por %p2078_p6, %p2077_p3 }
  0x82   : > { %p2080_p12 = pnand %p2079_p11, %p2073_p9 }
  0x84   : > { %2083 = shalt.err (!%p2080_p12)
}
  0x85   : > { %s2084_s21 = scalar_lea.vmem %s2472_s10, 192  ;;  %s2241_s9 = smov [#allocation3]  }
  0x86   : > { %p2085_p5 = scmp.ne.s32.totalorder %s2472_s10, %s2084_s21  ;;  %s2089_s17 = sshll.u32 %s2241_s9, 4  ;;  %s2090_s17 = int_to_ptr.vmem [resolvable:$false] %s2089_s17 }
  0x87   : > { %s2091_s1 = scalar_lea.vmem %s2090_s17, 384  ;;  %p2092_p13 = scmp.lt.s32.totalorder %s2472_s10, %s2090_s17 }
  0x88   : > { %p2087_p7 = pnand %p2085_p5, %p2071_p8  ;;  %p2093_p4 = scmp.lt.s32.totalorder %s2091_s1, %s2084_s21 }
  0x8a   : > { %p2088_p0 = pneg %p2087_p7  ;;  %p2094_p1 = por %p2093_p4, %p2092_p13 }
  0x8c   : > { %p2095_p3 = pnand %p2094_p1, %p2088_p0 }
  0x8e   : > { %2098 = shalt.err (!%p2095_p3)
}
  0x8f   : > { %1882 = dma.hbm_to_vmem [thread:$0]  (!%p2463_p2), %s2470_s16, 192, %s2472_s10, %s282_s18  }
  0x90   : > { %p2752_p9 = scmp.ne.s32.totalorder %s2743_s8, 0 }
  0x91   : > { %s2502_s11 = sand.u32 (!%p2752_p9), 1, %s2225_s25  }
  0x92   : > { %302 = sbr.rel (%p2752_p9) target bundleno = 1049 (0x419), region = 40  ;;  %s305_s15 = scalar_lea.sflag (!%p2752_p9), [#allocation4], %s2502_s11 }
  0x93   : > { %s1839_s29 = smul.u32 (!%p2752_p9), 12, %s2502_s11 }
  0x95   : > { %s308_s12 = scalar_lea.vmem (!%p2752_p9), [#allocation3], %s1839_s29 }
  0x99   : > { %2200 = dma.done.wait (%p2445_p10), %s305_s15, 192  }
  0x9a   : > { %2202 = vsyncadd (%p2445_p10), %s305_s15, 4294967104  ;;  %p2753_p13 = scmp.eq.s32.totalorder %s2318_s30, 0 }
  0x9c   : > { %2204 = dma.done.wait (%p2753_p13), [#allocation7], 256   ;;  %p2754_p0 = pmov %p2753_p13 }
  0x9e   : > { %2206 = vsyncadd (%p2754_p0), [#allocation7], 4294967040  ;;  %p2755_p2 = pmov %p2754_p0 }
  0x9f   : > { %p2756_p8 = pmov %p2754_p0 }
  0xa0   : > { %2208 = dma.done.wait (%p2755_p2), [#allocation10], 624  }
  0xa1   : > { %2210 = vsyncadd (%p2756_p8), [#allocation10], 4294966672  ;;  %v2242_v0 = vmov 0   ;;  %v376_v1 = vld [vmem:[#allocation6] sm:$0xff]  ;;  %v385_v2 = vld [vmem:[#allocation8] sm:$0xff]  ;;  %vm366_vm0 = vcmask 150528   ;;  %v398_v3 = vlaneseq }
  0xa2   : > { %1953 = vset.pattern.permute.xlu0 %v2242_v0  ;;  %511 = vmatprep.mubr.bf16.mxu0 %v2242_v0  ;;  %367 = vst.msk [vmem:[#allocation2] sm:$0xf] %vm366_vm0, %v2242_v0  ;;  %v371_v4 = vld [vmem:[%s308_s12] sm:$0xff]  ;;  %v372_v5 = vld [vmem:[%s308_s12 + $0x8] sm:$0xf]  ;;  %vm368_vm1 = vcmask 699800  }
  0xa3   : > { %379 = vperm.xlu0 %1953, %v376_v1   ;;  %v399_v6 = vshrl.u32 %v398_v3, 7  ;;  %v373_v7 = vunpack.c.l.bf16 %v371_v4  ;;  %v374_v8 = vunpack.c.h.bf16 %v371_v4  ;;  %v375_v9 = vunpack.c.l.bf16 %v372_v5  ;;  %v370_v12 = vld [vmem:[#allocation11] sm:$0x7]  ;;  %369 = vst.msk [vmem:[#allocation2 + $0x8] sm:$0xf] %vm368_vm1, %v2242_v0  ;;  %s2243_s8 = smov 19  }
  0xa4   : > { %vm437_vm2 = vcmask 1043608   ;;  %vm438_vm3 = vcmask 1047556   ;;  %vm432_vm4 = vcmask 154624   ;;  %vm441_vm6 = vcmask 412672   ;;  %s2246_s22 = smov 127   ;;  %s2247_s14 = smov 126  }
  0xa5   : > { %v400_v11 = vsub.s32 0, %v399_v6  ;;  %v404_v13 = vsub.s32 1, %v399_v6  ;;  %v408_v14 = vsub.s32 2, %v399_v6  ;;  %vm439_vm5 = vmor %vm438_vm3, %vm437_vm2  ;;  %v2244_v38 = vmov 0.0   ;;  %s2248_s16 = smov 110   ;;  %s2249_s10 = smov 109  }
  0xa6   : > { %1719 = vmatprep.subr.bf16.mxu1 %v2244_v38  ;;  %vm2245_vm7 = vmmov 0   ;;  %s2250_s18 = smov 108   ;;  %s2251_s13 = smov 92   ;;  %vm462_vm8 = vcmask 1039360   ;;  %vm469_vm9 = vcmask 1043456   ;;  %vm465_vm10 = vcmask 64512  }
  0xa7   : > { %388 = vperm.xlu0 %1953, %v385_v2   ;;  %v2521_v19 = vrot.slane %v370_v12, %v400_v11  ;;  %v2524_v23 = vrot.slane %v370_v12, %v404_v13  ;;  %v2526_v27 = vrot.slane %v370_v12, %v408_v14  ;;  %1721 = vmatprep.mubr.msk.bf16.mxu1 %vm2245_vm7, %v2244_v38  ;;  %s2252_s21 = smov 91   ;;  %s2253_s9 = smov 90   ;;  %v447_v51 = vld [vmem:[#allocation9 + $0x4] sm:$0xf]  ;;  %vm661_vm11 = vcmask 1031168  }
  0xa8   : > { %v443_v58 = vld [vmem:[#allocation9] sm:$0xf]  ;;  %vm768_vm12 = vcmask 900096   ;;  %v654_v3 = vld [vmem:[#allocation9 + $0x8] sm:$0xf]  ;;  %vm875_vm13 = vcmask 891904  }
  0xa9   : > { %v761_v11 = vld [vmem:[#allocation9 + $0xc] sm:$0xf]  ;;  %vm982_vm14 = vcmask 883712   ;;  %vm1089_vm15 = vcmask 752640   ;;  %vm1196_vm0 = vcmask 744448   ;;  %vm1303_vm1 = vcmask 736256  }
  0xaa   : > { %s1840_s17 = smul.u32 24, %s2502_s11  ;;  %vm1406_vm2 = vcmask 261120   ;;  %p2757_p6 = scmp.ne.s32.totalorder %s2749_s23, 0 }
  0xab   : > { %s1841_s15 = smul.u32 384, %s2318_s30 }
  0xac   : > { %s350_s1 = scalar_lea.vmem [#allocation12], %s1840_s17 }
  0xad   : > { %s1450_s29 = sshll.u32 %s350_s1, 4  ;;  %s2619_s29 = int_to_ptr.vmem [resolvable:$true] %s1450_s29 }
 0x122   : > { %v380_v10 = vpop.permute.xlu0 %379 }
 0x123   : > { %v382_v15 = vmul.f32 %v380_v10, %v373_v7  ;;  %v383_v16 = vmul.f32 %v380_v10, %v374_v8  ;;  %v384_v17 = vmul.f32 %v380_v10, %v375_v9 }
 0x126   : > { %v389_v18 = vpop.permute.xlu0 %388 }
 0x127   : > { %v391_v20 = vadd.f32 %v389_v18, %v382_v15  ;;  %v392_v21 = vadd.f32 %v389_v18, %v383_v16  ;;  %v393_v22 = vadd.f32 %v389_v18, %v384_v17 }
 0x129   : > { %v394_v24 = vmax.f32 %v391_v20, 0.0  ;;  %v395_v25 = vmax.f32 %v392_v21, 0.0  ;;  %v396_v26 = vmax.f32 %v393_v22, 0.0  ;;  %v868_v20 = vld [vmem:[#allocation9 + $0x10] sm:$0xf] }
 0x12b   : > { %v413_v28 = vmul.f32 %v2521_v19, %v394_v24  ;;  %v414_v29 = vmul.f32 %v2524_v23, %v395_v25  ;;  %v415_v31 = vmul.f32 %v2526_v27, %v396_v26 }
 0x12d   : > { %v1699_v30 = vpack.c.bf16 %v414_v29, %v413_v28  ;;  %v1700_v32 = vpack.c.bf16 %v415_v31, %v415_v31 }
 0x12f   : > { %427 = vrot.lane.b32.xlu1 %v1699_v30, %s2243_s8  ;;  %v975_v30 = vld [vmem:[#allocation9 + $0x14] sm:$0xf] }
 0x133   : > { %429 = vrot.lane.b32.xlu1 %v1700_v32, %s2243_s8 }
 0x1a1   : > { %v428_v33 = vpop.permute.xlu1 %427 }
 0x1a2   : > { %v431_v34 = vrot.slane %v428_v33, 4 }
 0x1a4   : > { %v433_v35 = vsel %vm432_vm4, %v431_v34, %v428_v33 }
 0x1a5   : > { %440 = vst.msk [vmem:[#allocation2] sm:$0xff] %vm439_vm5, %v433_v35  ;;  %v430_v36 = vpop.permute.xlu1 %429 }
 0x1a6   : > { %v434_v37 = vsel %vm432_vm4, %v431_v34, %v430_v36 }
 0x1a7   : > { %442 = vst.msk [vmem:[#allocation2 + $0x8] sm:$0xf] %vm441_vm6, %v434_v37 }
 0x1ac   : > { %v444_v39 = vld [vmem:[#allocation2] sm:$0xff] }
 0x1ad   : > { %v1662_v40 = vcombine.low %v444_v39, %v444_v39  ;;  %v1663_v41 = vcombine.high %v444_v39, %v444_v39  ;;  %v1082_v39 = vld [vmem:[#allocation9 + $0x18] sm:$0xf] }
 0x1ae   : > { %v1956_v42 = vld [vmem:[#allocation2 + $0x8] ss:$0 sps:$4 sm:$0xff]  }
 0x1af   : > { %458 = vrot.lane.b32.xlu1 %v1663_v41, %s2246_s22  ;;  %456 = vrot.lane.b32.xlu0 %v1662_v40, %s2246_s22  ;;  %v570_v54 = vsel %vm469_vm9, %v1956_v42, 0  ;;  %v564_v55 = vsel %vm469_vm9, %v1662_v40, 0 }
 0x1b3   : > { %655 = vrot.lane.b32.xlu1 %v1662_v40, %s2247_s14  ;;  %460 = vrot.lane.b32.xlu0 %v1956_v42, %s2246_s22  ;;  %s1448_s22 = scalar_lea.hbm %s2735_s5, %s1841_s15 }
 0x1b7   : > { %659 = vrot.lane.b32.xlu1 %v1956_v42, %s2247_s14  ;;  %657 = vrot.lane.b32.xlu0 %v1663_v41, %s2247_s14  ;;  %s1426_s14 = scalar_lea.sflag [#allocation5], %s2502_s11 }
 0x1bb   : > { %764 = vrot.lane.b32.xlu1 %v1663_v41, %s2248_s16  ;;  %762 = vrot.lane.b32.xlu0 %v1662_v40, %s2248_s16 }
 0x1bf   : > { %869 = vrot.lane.b32.xlu1 %v1662_v40, %s2249_s10  ;;  %766 = vrot.lane.b32.xlu0 %v1956_v42, %s2248_s16  ;;  %s2099_s16 = scalar_lea.vmem %s2619_s29, 384 }
 0x1c0   : > { %p2100_p10 = scmp.ne.s32.totalorder %s2619_s29, %s2099_s16 }
 0x1c2   : > { %p2101_p11 = pnand %p2100_p10, %p2757_p6 }
 0x1c3   : > { %873 = vrot.lane.b32.xlu1 %v1956_v42, %s2249_s10  ;;  %871 = vrot.lane.b32.xlu0 %v1663_v41, %s2249_s10  ;;  %s2254_s10 = smov [#allocation12]  }
 0x1c4   : > { %p2102_p12 = pneg %p2101_p11 }
 0x1c7   : > { %978 = vrot.lane.b32.xlu1 %v1663_v41, %s2250_s18  ;;  %976 = vrot.lane.b32.xlu0 %v1662_v40, %s2250_s18 }
 0x1cb   : > { %1083 = vrot.lane.b32.xlu1 %v1662_v40, %s2251_s13  ;;  %980 = vrot.lane.b32.xlu0 %v1956_v42, %s2250_s18  ;;  %s2103_s18 = sshll.u32 %s2254_s10, 4  ;;  %s2104_s18 = int_to_ptr.vmem [resolvable:$false] %s2103_s18 }
 0x1cc   : > { %p2106_p5 = scmp.lt.s32.totalorder %s2619_s29, %s2104_s18 }
 0x1cf   : > { %1087 = vrot.lane.b32.xlu1 %v1956_v42, %s2251_s13  ;;  %1085 = vrot.lane.b32.xlu0 %v1663_v41, %s2251_s13  ;;  %s2105_s13 = scalar_lea.vmem %s2104_s18, 768 }
 0x1d0   : > { %p2107_p7 = scmp.lt.s32.totalorder %s2105_s13, %s2099_s16 }
 0x1d2   : > { %p2108_p4 = por %p2107_p7, %p2106_p5 }
 0x1d3   : > { %1192 = vrot.lane.b32.xlu1 %v1663_v41, %s2252_s21  ;;  %1190 = vrot.lane.b32.xlu0 %v1662_v40, %s2252_s21 }
 0x1d4   : > { %p2109_p1 = pnand %p2108_p4, %p2102_p12 }
 0x1d7   : > { %1297 = vrot.lane.b32.xlu1 %v1662_v40, %s2253_s9  ;;  %1194 = vrot.lane.b32.xlu0 %v1956_v42, %s2252_s21 }
 0x1db   : > { %1301 = vrot.lane.b32.xlu1 %v1956_v42, %s2253_s9  ;;  %1299 = vrot.lane.b32.xlu0 %v1663_v41, %s2253_s9 }
 0x221   : > { %v459_v43 = vpop.permute.xlu1 %458  ;;  %v457_v44 = vpop.permute.xlu0 %456 }
 0x222   : > { %v463_v45 = vsel %vm462_vm8, %v457_v44, %v459_v43 }
 0x223   : > { %v471_v50 = vsel %vm469_vm9, %v463_v45, 0 }
 0x225   : > { %v656_v46 = vpop.permute.xlu1 %655  ;;  %v461_v47 = vpop.permute.xlu0 %460 }
 0x226   : > { %v464_v48 = vsel %vm462_vm8, %v459_v43, %v461_v47  ;;  %v477_v49 = vsel %vm469_vm9, %v461_v47, 0 }
 0x227   : > { %1665 = vmatprep.subr.msk.bf16.mxu0 %vm469_vm9, %v464_v48  ;;  %1720 = vmatpush3.bf16.msra.mxu1 %v477_v49 }
 0x228   : > { %480 = vmatpush1.bf16.msra.mxu0 %v471_v50  ;;  %1725 = vmatprep.subr.bf16.mxu1 %v2244_v38  ;;  %v1296_v50 = vld [vmem:[#allocation9 + $0x20] sm:$0xf] }
 0x229   : > { %v660_v52 = vpop.permute.xlu1 %659  ;;  %1668 = vmatprep.subr.msk.bf16.mxu0 %vm469_vm9, %v1663_v41  ;;  %v658_v53 = vpop.permute.xlu0 %657 }
 0x22a   : > { %1722 = vmatmul.mubr.msk.bf16.vlgmr.msra.gmra.mrb[0].mxu1 %vm465_vm10, %v447_v51  ;;  %v663_v56 = vsel %vm661_vm11, %v658_v53, %v660_v52  ;;  %v662_v59 = vsel %vm661_vm11, %v656_v46, %v658_v53  ;;  %v674_v62 = vsel %vm469_vm9, %v660_v52, 0  ;;  %v1189_v46 = vld [vmem:[#allocation9 + $0x1c] sm:$0xf] }
 0x22b   : > { %1666 = vmatmul.mubr.msk.bf16.vlgmr.msra.gmra.mrb[0].mxu0 %vm465_vm10, %v447_v51  ;;  %1726 = vmatpush3.bf16.msra.mxu1 %v570_v54  ;;  %v668_v63 = vsel %vm469_vm9, %v662_v59, 0 }
 0x22c   : > { %573 = vmatpush1.bf16.msra.mxu0 %v564_v55  ;;  %1727 = vmatprep.mubr.msk.bf16.mxu1 %vm2245_vm7, %v2244_v38 }
 0x22d   : > { %1671 = vmatprep.subr.msk.bf16.mxu0 %vm469_vm9, %v663_v56  ;;  %1731 = vmatprep.subr.bf16.mxu1 %v2244_v38  ;;  %v763_v57 = vpop.permute.xlu0 %762  ;;  %v765_v60 = vpop.permute.xlu1 %764 }
 0x22e   : > { %604 = vmatprep.mubr.bf16.mxu0 %v2242_v0  ;;  %v769_v4 = vsel %vm768_vm12, %v763_v57, %v765_v60 }
 0x22f   : > { %v775_v8 = vsel %vm469_vm9, %v769_v4, 0 }
 0x231   : > { %v767_v61 = vpop.permute.xlu0 %766  ;;  %v870_v2 = vpop.permute.xlu1 %869 }
 0x232   : > { %v770_v1 = vsel %vm768_vm12, %v765_v60, %v767_v61  ;;  %v781_v7 = vsel %vm469_vm9, %v767_v61, 0 }
 0x235   : > { %v874_v5 = vpop.permute.xlu1 %873  ;;  %v872_v6 = vpop.permute.xlu0 %871 }
 0x236   : > { %1728 = vmatmul.mubr.msk.bf16.vlgmr.msra.gmra.mrb[0].mxu1 %vm465_vm10, %v443_v58  ;;  %v877_v9 = vsel %vm875_vm13, %v872_v6, %v874_v5  ;;  %v876_v12 = vsel %vm875_vm13, %v870_v2, %v872_v6  ;;  %v888_v15 = vsel %vm469_vm9, %v874_v5, 0 }
 0x237   : > { %1732 = vmatpush3.bf16.msra.mxu1 %v674_v62  ;;  %1669 = vmatmul.mubr.msk.bf16.vlgmr.msra.gmra.mrb[0].mxu0 %vm465_vm10, %v443_v58  ;;  %v882_v16 = vsel %vm469_vm9, %v876_v12, 0 }
 0x238   : > { %677 = vmatpush1.bf16.msra.mxu0 %v668_v63  ;;  %1733 = vmatprep.mubr.msk.bf16.mxu1 %vm2245_vm7, %v2244_v38 }
 0x239   : > { %1674 = vmatprep.subr.msk.bf16.mxu0 %vm469_vm9, %v770_v1  ;;  %1737 = vmatprep.subr.bf16.mxu1 %v2244_v38  ;;  %v977_v10 = vpop.permute.xlu0 %976  ;;  %v979_v13 = vpop.permute.xlu1 %978 }
 0x23a   : > { %708 = vmatprep.mubr.bf16.mxu0 %v2242_v0  ;;  %v983_v21 = vsel %vm982_vm14, %v977_v10, %v979_v13 }
 0x23b   : > { %v989_v26 = vsel %vm469_vm9, %v983_v21, 0 }
 0x23d   : > { %v981_v14 = vpop.permute.xlu0 %980  ;;  %v1084_v18 = vpop.permute.xlu1 %1083 }
 0x23e   : > { %v984_v17 = vsel %vm982_vm14, %v979_v13, %v981_v14  ;;  %v995_v25 = vsel %vm469_vm9, %v981_v14, 0 }
 0x241   : > { %v1088_v22 = vpop.permute.xlu1 %1087  ;;  %v1086_v24 = vpop.permute.xlu0 %1085 }
 0x242   : > { %1734 = vmatmul.mubr.msk.bf16.vlgmr.msra.gmra.mrb[0].mxu1 %vm465_vm10, %v654_v3  ;;  %v1091_v28 = vsel %vm1089_vm15, %v1086_v24, %v1088_v22  ;;  %v1090_v31 = vsel %vm1089_vm15, %v1084_v18, %v1086_v24  ;;  %v1102_v34 = vsel %vm469_vm9, %v1088_v22, 0 }
 0x243   : > { %1738 = vmatpush3.bf16.msra.mxu1 %v781_v7  ;;  %1672 = vmatmul.mubr.msk.bf16.vlgmr.msra.gmra.mrb[0].mxu0 %vm465_vm10, %v654_v3  ;;  %v1096_v35 = vsel %vm469_vm9, %v1090_v31, 0 }
 0x244   : > { %784 = vmatpush1.bf16.msra.mxu0 %v775_v8  ;;  %1739 = vmatprep.mubr.msk.bf16.mxu1 %vm2245_vm7, %v2244_v38 }
 0x245   : > { %1677 = vmatprep.subr.msk.bf16.mxu0 %vm469_vm9, %v877_v9  ;;  %1743 = vmatprep.subr.bf16.mxu1 %v2244_v38  ;;  %v1191_v29 = vpop.permute.xlu0 %1190  ;;  %v1193_v32 = vpop.permute.xlu1 %1192 }
 0x246   : > { %815 = vmatprep.mubr.bf16.mxu0 %v2242_v0  ;;  %v1197_v40 = vsel %vm1196_vm0, %v1191_v29, %v1193_v32 }
 0x247   : > { %v1203_v44 = vsel %vm469_vm9, %v1197_v40, 0 }
 0x249   : > { %v1195_v33 = vpop.permute.xlu0 %1194  ;;  %v1298_v37 = vpop.permute.xlu1 %1297 }
 0x24a   : > { %v1198_v36 = vsel %vm1196_vm0, %v1193_v32, %v1195_v33  ;;  %v1209_v43 = vsel %vm469_vm9, %v1195_v33, 0 }
 0x24d   : > { %v1302_v41 = vpop.permute.xlu1 %1301  ;;  %v1300_v42 = vpop.permute.xlu0 %1299 }
 0x24e   : > { %1740 = vmatmul.mubr.msk.bf16.vlgmr.msra.gmra.mrb[0].mxu1 %vm465_vm10, %v761_v11  ;;  %v1305_v45 = vsel %vm1303_vm1, %v1300_v42, %v1302_v41  ;;  %v1304_v47 = vsel %vm1303_vm1, %v1298_v37, %v1300_v42  ;;  %v1316_v48 = vsel %vm469_vm9, %v1302_v41, 0 }
 0x24f   : > { %1744 = vmatpush3.bf16.msra.mxu1 %v888_v15  ;;  %1675 = vmatmul.mubr.msk.bf16.vlgmr.msra.gmra.mrb[0].mxu0 %vm465_vm10, %v761_v11  ;;  %v1310_v49 = vsel %vm469_vm9, %v1304_v47, 0 }
 0x250   : > { %891 = vmatpush1.bf16.msra.mxu0 %v882_v16  ;;  %1745 = vmatprep.mubr.msk.bf16.mxu1 %vm2245_vm7, %v2244_v38 }
 0x251   : > { %1680 = vmatprep.subr.msk.bf16.mxu0 %vm469_vm9, %v984_v17  ;;  %1749 = vmatprep.subr.bf16.mxu1 %v2244_v38 }
 0x252   : > { %922 = vmatprep.mubr.bf16.mxu0 %v2242_v0 }
 0x25a   : > { %1746 = vmatmul.mubr.msk.bf16.vlgmr.msra.gmra.mrb[0].mxu1 %vm465_vm10, %v868_v20 }
 0x25b   : > { %1750 = vmatpush3.bf16.msra.mxu1 %v995_v25  ;;  %1678 = vmatmul.mubr.msk.bf16.vlgmr.msra.gmra.mrb[0].mxu0 %vm465_vm10, %v868_v20 }
 0x25c   : > { %998 = vmatpush1.bf16.msra.mxu0 %v989_v26  ;;  %1751 = vmatprep.mubr.msk.bf16.mxu1 %vm2245_vm7, %v2244_v38 }
 0x25d   : > { %1683 = vmatprep.subr.msk.bf16.mxu0 %vm469_vm9, %v1091_v28  ;;  %1755 = vmatprep.subr.bf16.mxu1 %v2244_v38 }
 0x25e   : > { %1029 = vmatprep.mubr.bf16.mxu0 %v2242_v0 }
 0x266   : > { %1752 = vmatmul.mubr.msk.bf16.vlgmr.msra.gmra.mrb[0].mxu1 %vm465_vm10, %v975_v30 }
 0x267   : > { %1756 = vmatpush3.bf16.msra.mxu1 %v1102_v34  ;;  %1681 = vmatmul.mubr.msk.bf16.vlgmr.msra.gmra.mrb[0].mxu0 %vm465_vm10, %v975_v30 }
 0x268   : > { %1105 = vmatpush1.bf16.msra.mxu0 %v1096_v35  ;;  %1757 = vmatprep.mubr.msk.bf16.mxu1 %vm2245_vm7, %v2244_v38 }
 0x269   : > { %1686 = vmatprep.subr.msk.bf16.mxu0 %vm469_vm9, %v1198_v36  ;;  %1761 = vmatprep.subr.bf16.mxu1 %v2244_v38 }
 0x26a   : > { %1136 = vmatprep.mubr.bf16.mxu0 %v2242_v0 }
 0x272   : > { %1758 = vmatmul.mubr.msk.bf16.vlgmr.msra.gmra.mrb[0].mxu1 %vm465_vm10, %v1082_v39 }
 0x273   : > { %1762 = vmatpush3.bf16.msra.mxu1 %v1209_v43  ;;  %1684 = vmatmul.mubr.msk.bf16.vlgmr.msra.gmra.mrb[0].mxu0 %vm465_vm10, %v1082_v39 }
 0x274   : > { %1212 = vmatpush1.bf16.msra.mxu0 %v1203_v44  ;;  %1763 = vmatprep.mubr.msk.bf16.mxu1 %vm2245_vm7, %v2244_v38 }
 0x275   : > { %1689 = vmatprep.subr.msk.bf16.mxu0 %vm469_vm9, %v1305_v45  ;;  %1767 = vmatprep.subr.bf16.mxu1 %v2244_v38 }
 0x276   : > { %1243 = vmatprep.mubr.bf16.mxu0 %v2242_v0 }
 0x27e   : > { %1764 = vmatmul.mubr.msk.bf16.vlgmr.msra.gmra.mrb[0].mxu1 %vm465_vm10, %v1189_v46 }
 0x27f   : > { %1768 = vmatpush3.bf16.msra.mxu1 %v1316_v48  ;;  %1687 = vmatmul.mubr.msk.bf16.vlgmr.msra.gmra.mrb[0].mxu0 %vm465_vm10, %v1189_v46 }
 0x280   : > { %1319 = vmatpush1.bf16.msra.mxu0 %v1310_v49  ;;  %1769 = vmatprep.mubr.msk.bf16.mxu1 %vm2245_vm7, %v2244_v38 }
 0x281   : > { %1350 = vmatprep.mubr.bf16.mxu0 %v2242_v0 }
 0x28a   : > { %1770 = vmatmul.mubr.msk.bf16.vlgmr.msra.gmra.mrb[0].mxu1 %vm465_vm10, %v1296_v50 }
 0x28b   : > { %1690 = vmatmul.mubr.msk.bf16.vlgmr.msra.gmra.mrb[0].mxu0 %vm465_vm10, %v1296_v50 }
 0x35d   : > { %v1393_v51 = vpop.f32.mrb[0].mxu1 }
 0x35e   : > { %v1404_v52 = vmul.f32 %v1393_v51, %v2526_v27  ;;  %1424 = vst.msk [vmem:[%s350_s1 + $0x10] sm:$0xff] %vm1406_vm2, %v1393_v51  ;;  %v1352_v53 = vpop.f32.mrb[0].mxu0  ;;  %v1771_v54 = vpop.f32.mrb[1].mxu1 }
 0x35f   : > { %v1402_v55 = vmul.f32 %v1352_v53, %v2521_v19  ;;  %1422 = vst [vmem:[%s350_s1] sm:$0xff] %v1352_v53  ;;  %v1354_v38 = vpop.f32.mrb[1].mxu0  ;;  %v1396_v0 = vpop.f32.mrb[2].mxu1 }
 0x360   : > { %v1403_v56 = vmul.f32 %v1354_v38, %v2524_v23  ;;  %1423 = vst [vmem:[%s350_s1 + $0x8] sm:$0xff] %v1354_v38  ;;  %v1356_v57 = vpop.f32.mrb[2].mxu0  ;;  %v1772_v58 = vpop.f32.mrb[3].mxu1  ;;  %v1415_v59 = vmul.f32 %v1404_v52, %v1393_v51  ;;  %v1407_v63 = vsel %vm1406_vm2, %v1404_v52, 0.0 }
 0x361   : > { %v1413_v60 = vmul.f32 %v1402_v55, %v1352_v53  ;;  %v1357_v27 = vpop.f32.mrb[3].mxu0 }
 0x362   : > { %v1414_v61 = vmul.f32 %v1403_v56, %v1354_v38  ;;  %v1405_v62 = vadd.f32 %v1403_v56, %v1402_v55  ;;  %v1417_v2 = vsel %vm1406_vm2, %v1415_v59, 0.0 }
 0x364   : > { %v1408_v1 = vadd.f32 %v1407_v63, %v1405_v62  ;;  %v1416_v19 = vadd.f32 %v1414_v61, %v1413_v60 }
 0x366   : > { %1409 = vadd.xlane.f32.xlu0 %v1408_v1  ;;  %v1418_v3 = vadd.f32 %v1417_v2, %v1416_v19 }
 0x368   : > { %1419 = vadd.xlane.f32.xlu1 %v1418_v3 }
 0x369   : > { %2112 = shalt.err (!%p2109_p1)
}
 0x36a   : > { %s2113_s21 = scalar_lea.hbm %s1448_s22, 384  ;;  %s2117_s1 = scalar_lea.hbm %s2735_s5, 768 }
 0x36b   : > { %p2114_p3 = scmp.ne.s32.totalorder %s1448_s22, %s2113_s21  ;;  %p2118_p0 = scmp.lt.u32.totalorder %s1448_s22, %s2735_s5 }
 0x36c   : > { %p2119_p2 = scmp.lt.u32.totalorder %s2117_s1, %s2113_s21  ;;  %p2121_p10 = scmp.lt.u32.totalorder %s2113_s21, %s1448_s22 }
 0x36d   : > { %p2115_p9 = pnand %p2114_p3, %p2757_p6 }
 0x36e   : > { %p2120_p8 = por %p2119_p2, %p2118_p0 }
 0x36f   : > { %p2116_p13 = pneg %p2115_p9 }
 0x370   : > { %p2122_p11 = por %p2121_p10, %p2120_p8 }
 0x372   : > { %p2123_p12 = pnand %p2122_p11, %p2116_p13 }
 0x374   : > { %2126 = shalt.err (!%p2123_p12)
}
 0x375   : > { %1860 = dma.vmem_to_hbm [thread:$0]  (%p2757_p6), %s2619_s29, 384, %s1448_s22, %s1426_s14   ;;  %vm1411_vm3 = vcmask 7168  }
 0x376   : > { %s1658_s8 = sshll.u32 %s2502_s11, 3  ;;  %s1430_s16 = sand.u32 1, %s2318_s30  }
 0x377   : > { %s1695_s10 = sshll.u32 %s2318_s30, 7  ;;  %s357_s18 = scalar_lea.vmem [#allocation13], %s1658_s8 }
 0x378   : > { %s1463_s13 = sshll.u32 %s357_s18, 4  ;;  %s2644_s9 = scalar_lea.vmem [#allocation15], %s1658_s8  ;;  %s2652_s13 = int_to_ptr.vmem [resolvable:$true] %s1463_s13 }
 0x379   : > { %s1476_s21 = sshll.u32 %s2644_s9, 4  ;;  %s2650_s15 = scalar_lea.hbm %s2736_s6, %s1695_s10  ;;  %s2660_s21 = int_to_ptr.vmem [resolvable:$true] %s1476_s21 }
 0x37a   : > { %s2658_s29 = scalar_lea.hbm %s2737_s7, %s1695_s10  ;;  %s2662_s22 = scalar_lea.sflag [#allocation14], %s1430_s16 }
 0x37b   : > { %s2127_s14 = scalar_lea.vmem %s2652_s13, 128  ;;  %s2255_s12 = smov [#allocation13]  }
 0x37c   : > { %p2128_p5 = scmp.ne.s32.totalorder %s2652_s13, %s2127_s14  ;;  %s2131_s8 = sshll.u32 %s2255_s12, 4  ;;  %s2132_s8 = int_to_ptr.vmem [resolvable:$false] %s2131_s8 }
 0x37d   : > { %s2133_s17 = scalar_lea.vmem %s2132_s8, 256  ;;  %p2134_p1 = scmp.lt.s32.totalorder %s2652_s13, %s2132_s8 }
 0x37e   : > { %p2129_p7 = pnand %p2128_p5, %p2757_p6  ;;  %p2135_p3 = scmp.lt.s32.totalorder %s2133_s17, %s2127_s14 }
 0x380   : > { %p2130_p4 = pneg %p2129_p7  ;;  %p2136_p9 = por %p2135_p3, %p2134_p1 }
 0x382   : > { %p2137_p13 = pnand %p2136_p9, %p2130_p4 }
 0x3f3   : > { %v1410_v23 = vpop.xlane.xlu0 %1409 }
 0x3f4   : > { %1412 = vst.msk [vmem:[%s357_s18] sm:$0xff] %vm1411_vm3, %v1410_v23 }
 0x3f5   : > { %v1420_v4 = vpop.xlane.xlu1 %1419 }
 0x3f6   : > { %2140 = shalt.err (!%p2137_p13)
}
 0x3f7   : > { %s2141_s16 = scalar_lea.hbm %s2650_s15, 128  ;;  %s2145_s1 = scalar_lea.hbm %s2736_s6, 256 }
 0x3f8   : > { %p2142_p0 = scmp.ne.s32.totalorder %s2650_s15, %s2141_s16  ;;  %p2146_p10 = scmp.lt.u32.totalorder %s2650_s15, %s2736_s6 }
 0x3f9   : > { %p2147_p11 = scmp.lt.u32.totalorder %s2145_s1, %s2141_s16  ;;  %p2149_p5 = scmp.lt.u32.totalorder %s2141_s16, %s2650_s15 }
 0x3fa   : > { %p2143_p2 = pnand %p2142_p0, %p2757_p6 }
 0x3fb   : > { %p2148_p12 = por %p2147_p11, %p2146_p10 }
 0x3fc   : > { %p2144_p8 = pneg %p2143_p2 }
 0x3fd   : > { %p2150_p7 = por %p2149_p5, %p2148_p12 }
 0x3ff   : > { %p2151_p4 = pnand %p2150_p7, %p2144_p8 }
 0x401   : > { %2154 = shalt.err (!%p2151_p4)
}
 0x402   : > { %1861 = dma.vmem_to_hbm [thread:$0]  (%p2757_p6), %s2652_s13, 128, %s2650_s15, %s2662_s22   ;;  %1421 = vst.msk [vmem:[%s2644_s9] sm:$0xff] %vm1411_vm3, %v1420_v4 }
 0x403   : > { %s2155_s14 = scalar_lea.vmem %s2660_s21, 128  ;;  %s2256_s12 = smov [#allocation15]  }
 0x404   : > { %p2156_p1 = scmp.ne.s32.totalorder %s2660_s21, %s2155_s14  ;;  %s2159_s8 = sshll.u32 %s2256_s12, 4  ;;  %s2160_s8 = int_to_ptr.vmem [resolvable:$false] %s2159_s8 }
 0x405   : > { %s2161_s17 = scalar_lea.vmem %s2160_s8, 256  ;;  %p2162_p13 = scmp.lt.s32.totalorder %s2660_s21, %s2160_s8 }
 0x406   : > { %p2157_p3 = pnand %p2156_p1, %p2757_p6  ;;  %p2163_p0 = scmp.lt.s32.totalorder %s2161_s17, %s2155_s14 }
 0x408   : > { %p2158_p9 = pneg %p2157_p3  ;;  %p2164_p2 = por %p2163_p0, %p2162_p13 }
 0x40a   : > { %p2165_p8 = pnand %p2164_p2, %p2158_p9 }
 0x40c   : > { %2168 = shalt.err (!%p2165_p8)
}
 0x40d   : > { %s2169_s13 = scalar_lea.hbm %s2658_s29, 128  ;;  %s2173_s16 = scalar_lea.hbm %s2737_s7, 256 }
 0x40e   : > { %p2170_p10 = scmp.ne.s32.totalorder %s2658_s29, %s2169_s13  ;;  %p2174_p5 = scmp.lt.u32.totalorder %s2658_s29, %s2737_s7 }
 0x40f   : > { %p2175_p7 = scmp.lt.u32.totalorder %s2173_s16, %s2169_s13  ;;  %p2177_p1 = scmp.lt.u32.totalorder %s2169_s13, %s2658_s29 }
 0x410   : > { %p2171_p11 = pnand %p2170_p10, %p2757_p6 }
 0x411   : > { %p2176_p4 = por %p2175_p7, %p2174_p5 }
 0x412   : > { %p2172_p12 = pneg %p2171_p11 }
 0x413   : > { %p2178_p3 = por %p2177_p1, %p2176_p4 }
 0x415   : > { %p2179_p9 = pnand %p2178_p3, %p2172_p12 }
 0x417   : > { %2182 = shalt.err (!%p2179_p9)
}
 0x418   : > { %1862 = dma.vmem_to_hbm [thread:$0]  (%p2757_p6), %s2660_s21, 128, %s2658_s29, %s2662_s22  }
 0x419 PF: > { %s1488_s1 = sand.u32 1, %s2221_s24   ;;  %p2758_p13 = scmp.ne.s32.totalorder %s2750_s28, 0 }
 0x41a   : > { %p2759_p0 = scmp.ge.s32.totalorder %s2233_s27, 2  ;;  %s1489_s30 = scalar_lea.sflag [#allocation5], %s1488_s1 }
 0x41c   : > { %p1884_p2 = pnand %p2759_p0, %p2758_p13 }
 0x41e   : > { %2212 = dma.done.wait (!%p1884_p2), %s1489_s30, 384  }
 0x41f   : > { %2214 = vsyncadd (!%p1884_p2), %s1489_s30, 4294966912  ;;  %s2760_s11 = sadd.s32 4294967294, %s2233_s27  }
 0x420   : > { %s1497_s14 = sand.u32 1, %s2760_s11  }
 0x421   : > { %s1498_s12 = scalar_lea.sflag [#allocation14], %s1497_s14 }
 0x422   : > { %2216 = dma.done.wait (!%p1884_p2), %s1498_s12, 256  }
 0x423   : > { %2218 = vsyncadd (!%p1884_p2), %s1498_s12, 4294967040  ;;  %p26_p6 = scmp.ge.s32.totalorder %s2430_s19, 4   ;;  %s2761_s24 = smov %s2225_s25 }
 0x424   : > { %s2762_s25 = smov %s2229_s26  ;;  %s2763_s26 = smov %s2441_s20 }
 0x425   : > { %s2764_s27 = smov %s2430_s19  ;;  %28 = sbr.rel (!%p26_p6) target bundleno = 11 (0xb), region = 141 }
 0x42c   :  { %1512 = vsyncpa [#allocation4], 1 }
 0x42d   :  { %1514 = vsyncpa [#allocation4 + $0x1], 1 }
 0x42e   :  { %1515 = vsyncpa [#allocation7], 1 }
 0x42f   :  { %1516 = vsyncpa [#allocation10], 1 }
 0x430   :  { %1517 = vsyncpa [#allocation5], 1 }
 0x431   :  { %1519 = vsyncpa [#allocation5 + $0x1], 1 }
 0x432   :  { %1520 = vsyncpa [#allocation14], 1 }
 0x433   :  { %1522 = vsyncpa [#allocation14 + $0x1], 1 }

</bundles_post_ra>
